<compile_context>
chip_gen: v5e
topology: v5e:2x2
jax: 0.10.0
libtpu: 0.0.40
codegen_flags: <defaults>
</compile_context>

<pallas_src>
import jax
import jax.numpy as jnp
from jax import lax
from jax.experimental import pallas as pl
from jax.experimental.pallas import tpu as pltpu

LANE = 128  # pad every feature dim (and the node axis) to full lane width


def _round_up(v, m):
    return (v + m - 1) // m * m


# ----------------------------- fused Pallas kernel -------------------------

def make_fused_kernel(n_enc_layers, *, n_real, enc_slope, dec_slope, bn_eps):
    """Builds the fused forward kernel for a static number of encoder layers."""
    inv_n = 1.0 / float(n_real)

    def kernel(*refs):
        it = iter(refs)
        a_prelu_ref = next(it)                         # SMEM (1,) f32, PReLU slope
        a_ref = next(it)                               # (NP, NP) bf16 row-norm adjacency
        x_ref = next(it)                               # (NP, P)  bf16 padded node features
        enc = [(next(it), next(it), next(it))          # Wl (P,P) bf16, Wr (P,P) bf16, b (1,P) f32
               for _ in range(n_enc_layers)]
        wp_ref, bp_ref = next(it), next(it)            # projection head
        wd1_ref, bd1_ref = next(it), next(it)          # decoder linear 1
        g_ref, beta_ref = next(it), next(it)           # decoder BN affine
        wd2_ref, bd2_ref = next(it), next(it)          # decoder linear 2
        h_out, z_out, rec_out = next(it), next(it), next(it)

        A = a_ref[...]                                 # bf16 MXU operand
        h_bf = x_ref[...]                              # bf16 running activation
        h_f32 = h_bf.astype(jnp.float32)

        # ---- encoder: SAGEConv (mean aggr as matmul) + LeakyReLU(0.5) ----
        # Two accumulating dots per layer (no concat temporary); f32 accumulate.
        for wl_ref, wr_ref, b_ref in enc:
            agg = jnp.dot(A, h_bf, preferred_element_type=jnp.float32)
            y = (jnp.dot(agg.astype(jnp.bfloat16), wl_ref[...],
                         preferred_element_type=jnp.float32)
                 + jnp.dot(h_bf, wr_ref[...], preferred_element_type=jnp.float32)
                 + b_ref[...])
            h_f32 = jnp.where(y > 0, y, enc_slope * y)
            h_bf = h_f32.astype(jnp.bfloat16)
        h_out[...] = h_f32

        # ---- projection head: Linear + PReLU (scalar slope from SMEM) ----
        a = a_prelu_ref[0]
        yp = jnp.dot(h_bf, wp_ref[...], preferred_element_type=jnp.float32) + bp_ref[...]
        z_out[...] = jnp.where(yp > 0, yp, a * yp)

        # ---- decoder: Linear -> BN (batch stats, biased var) -> LeakyReLU -> Linear
        yd = jnp.dot(h_bf, wd1_ref[...], preferred_element_type=jnp.float32) + bd1_ref[...]
        # Padded node rows carry garbage; mask them out of the batch statistics
        # and normalize by the TRUE node count so BN stays exact.
        row_ids = lax.broadcasted_iota(jnp.int32, (yd.shape[0], 1), 0)
        rmask = (row_ids < n_real).astype(jnp.float32)
        ydm = yd * rmask
        s = jnp.sum(ydm, axis=0, keepdims=True)
        s2 = jnp.sum(ydm * ydm, axis=0, keepdims=True)
        mean = s * inv_n
        var = jnp.maximum(s2 * inv_n - mean * mean, 0.0)
        yn = (yd - mean) * lax.rsqrt(var + bn_eps) * g_ref[...] + beta_ref[...]
        yl = jnp.where(yn > 0, yn, dec_slope * yn)
        rec_out[...] = (jnp.dot(yl.astype(jnp.bfloat16), wd2_ref[...],
                                preferred_element_type=jnp.float32)
                        + bd2_ref[...])

    return kernel


# ----------------------------- host-side glue ------------------------------

def _pad2d(x, rows, cols, dtype):
    """Zero-pad a 2-D array up to (rows, cols) and cast to dtype."""
    out = jnp.zeros((rows, cols), dtype)
    return out.at[: x.shape[0], : x.shape[1]].set(x.astype(dtype))


def model_forward(x, A, params, *, enc_slope=0.5, dec_slope=0.01, bn_eps=1e-5):
    """Returns (h, z, rec, target) exactly like Model.forward (full-graph path)."""
    N, in_ch = x.shape
    P = LANE
    NP = _round_up(N, LANE)   # pad node axis so A@h contracts over full 128-wide tiles

    # --- pack / pad operands: bf16 for MXU operands, f32 for biases / BN affine.
    #     Zero feature-padding is exact: padded channels stay identically zero.
    A_p = _pad2d(A, NP, NP, jnp.bfloat16)
    x_p = _pad2d(x, NP, P, jnp.bfloat16)

    enc_args = []
    for (Wl, Wr, b) in params["encoder"]:
        enc_args += [_pad2d(Wl, P, P, jnp.bfloat16),
                     _pad2d(Wr, P, P, jnp.bfloat16),
                     _pad2d(b, 1, P, jnp.float32)]

    Wp, bp, a_prelu = params["project"]
    W1, b1, gamma, beta, W2, b2 = params["decoder"]

    args = [jnp.reshape(a_prelu, (1,)).astype(jnp.float32), A_p, x_p]
    args += enc_args
    args += [_pad2d(Wp, P, P, jnp.bfloat16), _pad2d(bp, 1, P, jnp.float32)]
    args += [_pad2d(W1, P, P, jnp.bfloat16), _pad2d(b1, 1, P, jnp.float32),
             _pad2d(gamma, 1, P, jnp.float32), _pad2d(beta, 1, P, jnp.float32),
             _pad2d(W2, P, P, jnp.bfloat16), _pad2d(b2, 1, P, jnp.float32)]

    out_shapes = (jax.ShapeDtypeStruct((NP, P), jnp.float32),   # h   (padded)
                  jax.ShapeDtypeStruct((NP, P), jnp.float32),   # z   (padded)
                  jax.ShapeDtypeStruct((NP, P), jnp.float32))   # rec (padded)

    # --- VMEM budget derived from actual shapes (A dominates), not hard-coded.
    in_bytes = sum(int(a.size) * a.dtype.itemsize for a in args[1:])
    out_bytes = 3 * NP * P * 4
    tmp_bytes = 8 * NP * P * 4                     # live f32 temporaries in the body
    need = int(1.25 * (in_bytes + out_bytes + tmp_bytes)) + (2 << 20)
    vmem_limit = min(max(need, 32 << 20), 96 << 20)   # cap below physical (64 MiB/TC on v7x -> tile sooner there)

    vmem = pl.BlockSpec(memory_space=pltpu.MemorySpace.VMEM)
    smem = pl.BlockSpec(memory_space=pltpu.MemorySpace.SMEM)
    in_specs = [smem] + [vmem] * (len(args) - 1)

    kernel = make_fused_kernel(len(params["encoder"]),
                               n_real=N, enc_slope=enc_slope,
                               dec_slope=dec_slope, bn_eps=bn_eps)

    h_p, z_p, rec_p = pl.pallas_call(
        kernel,
        out_shape=out_shapes,
        in_specs=in_specs,
        out_specs=(vmem, vmem, vmem),
        compiler_params=pltpu.CompilerParams(vmem_limit_bytes=vmem_limit),
    )(*args)

    # slice the lane-dense slabs back to real node / feature extents (layout glue)
    hid_last = params["encoder"][-1][0].shape[1]
    proj_dim = Wp.shape[1]
    h = h_p[:N, :hid_last]
    z = z_p[:N, :proj_dim]
    rec = rec_p[:N, :in_ch]
    return h, z, rec, x


# ----------------------------- pure-JAX f32 reference ----------------------

def model_forward_ref(x, A, params, *, enc_slope=0.5, dec_slope=0.01, bn_eps=1e-5):
    h = x
    for Wl, Wr, b in params["encoder"]:
        agg = A @ h
        y = agg @ Wl + h @ Wr + b
        h = jnp.where(y > 0, y, enc_slope * y)
    Wp, bp, a_prelu = params["project"]
    yp = h @ Wp + bp
    z = jnp.where(yp > 0, yp, a_prelu.reshape(()) * yp)
    W1, b1, gamma, beta, W2, b2 = params["decoder"]
    yd = h @ W1 + b1
    mean = jnp.mean(yd, axis=0, keepdims=True)
    var = jnp.mean((yd - mean) ** 2, axis=0, keepdims=True)
    yn = (yd - mean) / jnp.sqrt(var + bn_eps) * gamma + beta
    yl = jnp.where(yn > 0, yn, dec_slope * yn)
    rec = yl @ W2 + b2
    return h, z, rec, x


# ----------------------------- param init ----------------------------------

def init_params(key, in_channels, hidden_channels, project_hidden, decoder_hidden):
    keys = iter(jax.random.split(key, 64))

    def lin(k, fin, fout):
        scale = 1.0 / jnp.sqrt(jnp.float32(fin))
        return jax.random.uniform(k, (fin, fout), jnp.float32, -scale, scale)

    # encoder: SAGEConv layers (Wl acts on aggregated msgs, Wr on root feats)
    enc = []
    dims = [in_channels] + list(hidden_channels)
    for i in range(len(hidden_channels)):
        fin, fout = dims[i], dims[i + 1]
        Wl = lin(next(keys), fin, fout)
        Wr = lin(next(keys), fin, fout)
        b = jnp.zeros((1, fout), jnp.float32)
        enc.append((Wl, Wr, b))

    embed = hidden_channels[-1]

    # projection head: Linear + PReLU (single project_hidden layer supported here)
    pdim = project_hidden[0]
    Wp = lin(next(keys), embed, pdim)
    bp = jnp.zeros((1, pdim), jnp.float32)
    a_prelu = jnp.full((1, 1), 0.25, jnp.float32)   # torch PReLU default init

    # decoder: Linear -> BN -> LeakyReLU -> Linear(back to in_channels)
    ddim = decoder_hidden[0]
    W1 = lin(next(keys), embed, ddim)
    b1 = jnp.zeros((1, ddim), jnp.float32)
    gamma = jnp.ones((1, ddim), jnp.float32)
    beta = jnp.zeros((1, ddim), jnp.float32)
    W2 = lin(next(keys), ddim, in_channels)
    b2 = jnp.zeros((1, in_channels), jnp.float32)

    return {
        "encoder": enc,
        "project": (Wp, bp, a_prelu),
        "decoder": (W1, b1, gamma, beta, W2, b2),
    }


# ----------------------------- main ----------------------------------------

if __name__ == "__main__":
    N = 64             # number of nodes
    IN_CH = 16         # input feature dim
    HIDDEN = [32, 16]  # encoder hidden channels
    PROJECT = [16]     # projection head hidden
    DECODER = [32]     # decoder hidden
    E = 256            # number of edges

    key = jax.random.PRNGKey(0)
    kx, ke1, ke2, kp = jax.random.split(key, 4)

    # node features
    x = jax.random.normal(kx, (N, IN_CH), jnp.float32)

    # deterministic synthetic edge_index (src -> dst), converted to dense
    # row-normalized adjacency (glue, outside the kernel)
    src = jax.random.randint(ke1, (E,), 0, N)
    dst = jax.random.randint(ke2, (E,), 0, N)
    adj = jnp.zeros((N, N), jnp.float32).at[dst, src].add(1.0)
    deg = jnp.sum(adj, axis=1, keepdims=True)
    A = adj / jnp.maximum(deg, 1.0)   # rows with no in-edges stay all-zero (PyG mean -> 0)

    params = init_params(kp, IN_CH, HIDDEN, PROJECT, DECODER)

    h, z, rec, target = jax.jit(model_forward)(x, A, params)
    jax.block_until_ready((h, z, rec, target))

    assert h.shape == (N, HIDDEN[-1])
    assert z.shape == (N, PROJECT[-1])
    assert rec.shape == (N, IN_CH)
    assert target.shape == (N, IN_CH)
    assert all(bool(jnp.isfinite(t).all()) for t in (h, z, rec, target))

    # tolerance check of the bf16-operand kernel against the pure-JAX f32 path
    h_r, z_r, rec_r, _ = model_forward_ref(x, A, params)

    def relerr(a, b):
        return float(jnp.max(jnp.abs(a - b)) / (jnp.max(jnp.abs(b)) + 1e-6))

    assert relerr(h, h_r) < 8e-2, relerr(h, h_r)
    assert relerr(z, z_r) < 8e-2, relerr(z, z_r)
    assert relerr(rec, rec_r) < 8e-2, relerr(rec, rec_r)

    print("KERNEL_OK")
</pallas_src>

<mosaic_0001>
module attributes {stable_mosaic.version = 11 : i64} {
  func.func @kernel(%arg0: memref<1xf32, #tpu.memory_space<smem>>, %arg1: memref<128x128xbf16, #tpu.memory_space<vmem>>, %arg2: memref<128x128xbf16, #tpu.memory_space<vmem>>, %arg3: memref<128x128xbf16, #tpu.memory_space<vmem>>, %arg4: memref<128x128xbf16, #tpu.memory_space<vmem>>, %arg5: memref<1x128xf32, #tpu.memory_space<vmem>>, %arg6: memref<128x128xbf16, #tpu.memory_space<vmem>>, %arg7: memref<128x128xbf16, #tpu.memory_space<vmem>>, %arg8: memref<1x128xf32, #tpu.memory_space<vmem>>, %arg9: memref<128x128xbf16, #tpu.memory_space<vmem>>, %arg10: memref<1x128xf32, #tpu.memory_space<vmem>>, %arg11: memref<128x128xbf16, #tpu.memory_space<vmem>>, %arg12: memref<1x128xf32, #tpu.memory_space<vmem>>, %arg13: memref<1x128xf32, #tpu.memory_space<vmem>>, %arg14: memref<1x128xf32, #tpu.memory_space<vmem>>, %arg15: memref<128x128xbf16, #tpu.memory_space<vmem>>, %arg16: memref<1x128xf32, #tpu.memory_space<vmem>>, %arg17: memref<128x128xf32, #tpu.memory_space<vmem>>, %arg18: memref<128x128xf32, #tpu.memory_space<vmem>>, %arg19: memref<128x128xf32, #tpu.memory_space<vmem>>) attributes {dimension_semantics = [], scalar_prefetch = 0 : i64, scratch_operands = 0 : i64, tpu.core_type = #tpu.core_type<tc>} {
    %c0 = arith.constant 0 : index
    %c0_0 = arith.constant 0 : index
    %0 = vector.load %arg1[%c0, %c0_0] : memref<128x128xbf16, #tpu.memory_space<vmem>>, vector<128x128xbf16>
    %c0_1 = arith.constant 0 : index
    %c0_2 = arith.constant 0 : index
    %1 = vector.load %arg2[%c0_1, %c0_2] : memref<128x128xbf16, #tpu.memory_space<vmem>>, vector<128x128xbf16>
    %cst = arith.constant dense<0.000000e+00> : vector<128x128xf32>
    %2 = tpu.matmul %0, %1, %cst {dimension_numbers = #tpu.dot_dimension_numbers<[1], [0], [0], [1], [0, 0, 1, 1], [], []>} : vector<128x128xbf16>, vector<128x128xbf16>, vector<128x128xf32> -> vector<128x128xf32>
    %3 = arith.truncf %2 : vector<128x128xf32> to vector<128x128xbf16>
    %c0_3 = arith.constant 0 : index
    %c0_4 = arith.constant 0 : index
    %4 = vector.load %arg3[%c0_3, %c0_4] : memref<128x128xbf16, #tpu.memory_space<vmem>>, vector<128x128xbf16>
    %cst_5 = arith.constant dense<0.000000e+00> : vector<128x128xf32>
    %5 = tpu.matmul %3, %4, %cst_5 {dimension_numbers = #tpu.dot_dimension_numbers<[1], [0], [0], [1], [0, 0, 1, 1], [], []>} : vector<128x128xbf16>, vector<128x128xbf16>, vector<128x128xf32> -> vector<128x128xf32>
    %c0_6 = arith.constant 0 : index
    %c0_7 = arith.constant 0 : index
    %6 = vector.load %arg4[%c0_6, %c0_7] : memref<128x128xbf16, #tpu.memory_space<vmem>>, vector<128x128xbf16>
    %cst_8 = arith.constant dense<0.000000e+00> : vector<128x128xf32>
    %7 = tpu.matmul %1, %6, %cst_8 {dimension_numbers = #tpu.dot_dimension_numbers<[1], [0], [0], [1], [0, 0, 1, 1], [], []>} : vector<128x128xbf16>, vector<128x128xbf16>, vector<128x128xf32> -> vector<128x128xf32>
    %8 = arith.addf %5, %7 : vector<128x128xf32>
    %c0_9 = arith.constant 0 : index
    %c0_10 = arith.constant 0 : index
    %9 = vector.load %arg5[%c0_9, %c0_10] : memref<1x128xf32, #tpu.memory_space<vmem>>, vector<1x128xf32>
    %10 = vector.broadcast %9 : vector<1x128xf32> to vector<128x128xf32>
    %11 = arith.addf %8, %10 : vector<128x128xf32>
    %cst_11 = arith.constant 0.000000e+00 : f32
    %12 = vector.broadcast %cst_11 : f32 to vector<128x128xf32>
    %13 = arith.cmpf ogt, %11, %12 : vector<128x128xf32>
    %cst_12 = arith.constant 5.000000e-01 : f32
    %14 = vector.broadcast %cst_12 : f32 to vector<128x128xf32>
    %15 = arith.mulf %14, %11 : vector<128x128xf32>
    %16 = arith.select %13, %11, %15 : vector<128x128xi1>, vector<128x128xf32>
    %17 = arith.truncf %16 : vector<128x128xf32> to vector<128x128xbf16>
    %cst_13 = arith.constant dense<0.000000e+00> : vector<128x128xf32>
    %18 = tpu.matmul %0, %17, %cst_13 {dimension_numbers = #tpu.dot_dimension_numbers<[1], [0], [0], [1], [0, 0, 1, 1], [], []>} : vector<128x128xbf16>, vector<128x128xbf16>, vector<128x128xf32> -> vector<128x128xf32>
    %19 = arith.truncf %18 : vector<128x128xf32> to vector<128x128xbf16>
    %c0_14 = arith.constant 0 : index
    %c0_15 = arith.constant 0 : index
    %20 = vector.load %arg6[%c0_14, %c0_15] : memref<128x128xbf16, #tpu.memory_space<vmem>>, vector<128x128xbf16>
    %cst_16 = arith.constant dense<0.000000e+00> : vector<128x128xf32>
    %21 = tpu.matmul %19, %20, %cst_16 {dimension_numbers = #tpu.dot_dimension_numbers<[1], [0], [0], [1], [0, 0, 1, 1], [], []>} : vector<128x128xbf16>, vector<128x128xbf16>, vector<128x128xf32> -> vector<128x128xf32>
    %c0_17 = arith.constant 0 : index
    %c0_18 = arith.constant 0 : index
    %22 = vector.load %arg7[%c0_17, %c0_18] : memref<128x128xbf16, #tpu.memory_space<vmem>>, vector<128x128xbf16>
    %cst_19 = arith.constant dense<0.000000e+00> : vector<128x128xf32>
    %23 = tpu.matmul %17, %22, %cst_19 {dimension_numbers = #tpu.dot_dimension_numbers<[1], [0], [0], [1], [0, 0, 1, 1], [], []>} : vector<128x128xbf16>, vector<128x128xbf16>, vector<128x128xf32> -> vector<128x128xf32>
    %24 = arith.addf %21, %23 : vector<128x128xf32>
    %c0_20 = arith.constant 0 : index
    %c0_21 = arith.constant 0 : index
    %25 = vector.load %arg8[%c0_20, %c0_21] : memref<1x128xf32, #tpu.memory_space<vmem>>, vector<1x128xf32>
    %26 = vector.broadcast %25 : vector<1x128xf32> to vector<128x128xf32>
    %27 = arith.addf %24, %26 : vector<128x128xf32>
    %cst_22 = arith.constant 0.000000e+00 : f32
    %28 = vector.broadcast %cst_22 : f32 to vector<128x128xf32>
    %29 = arith.cmpf ogt, %27, %28 : vector<128x128xf32>
    %cst_23 = arith.constant 5.000000e-01 : f32
    %30 = vector.broadcast %cst_23 : f32 to vector<128x128xf32>
    %31 = arith.mulf %30, %27 : vector<128x128xf32>
    %32 = arith.select %29, %27, %31 : vector<128x128xi1>, vector<128x128xf32>
    %33 = arith.truncf %32 : vector<128x128xf32> to vector<128x128xbf16>
    %c0_24 = arith.constant 0 : index
    %c0_25 = arith.constant 0 : index
    %34 = vector.load %arg17[%c0_24, %c0_25] : memref<128x128xf32, #tpu.memory_space<vmem>>, vector<128x128xf32>
    tpu.vector_store %arg17[%c0_24, %c0_25], %32 {strides = array<i32>} : memref<128x128xf32, #tpu.memory_space<vmem>>, vector<128x128xf32>,
    %c0_26 = arith.constant 0 : index
    %35 = memref.load %arg0[%c0_26] : memref<1xf32, #tpu.memory_space<smem>>
    %c0_27 = arith.constant 0 : index
    %c0_28 = arith.constant 0 : index
    %36 = vector.load %arg9[%c0_27, %c0_28] : memref<128x128xbf16, #tpu.memory_space<vmem>>, vector<128x128xbf16>
    %cst_29 = arith.constant dense<0.000000e+00> : vector<128x128xf32>
    %37 = tpu.matmul %33, %36, %cst_29 {dimension_numbers = #tpu.dot_dimension_numbers<[1], [0], [0], [1], [0, 0, 1, 1], [], []>} : vector<128x128xbf16>, vector<128x128xbf16>, vector<128x128xf32> -> vector<128x128xf32>
    %c0_30 = arith.constant 0 : index
    %c0_31 = arith.constant 0 : index
    %38 = vector.load %arg10[%c0_30, %c0_31] : memref<1x128xf32, #tpu.memory_space<vmem>>, vector<1x128xf32>
    %39 = vector.broadcast %38 : vector<1x128xf32> to vector<128x128xf32>
    %40 = arith.addf %37, %39 : vector<128x128xf32>
    %cst_32 = arith.constant 0.000000e+00 : f32
    %41 = vector.broadcast %cst_32 : f32 to vector<128x128xf32>
    %42 = arith.cmpf ogt, %40, %41 : vector<128x128xf32>
    %43 = vector.broadcast %35 : f32 to vector<128x128xf32>
    %44 = arith.mulf %43, %40 : vector<128x128xf32>
    %45 = arith.select %42, %40, %44 : vector<128x128xi1>, vector<128x128xf32>
    %c0_33 = arith.constant 0 : index
    %c0_34 = arith.constant 0 : index
    %46 = vector.load %arg18[%c0_33, %c0_34] : memref<128x128xf32, #tpu.memory_space<vmem>>, vector<128x128xf32>
    tpu.vector_store %arg18[%c0_33, %c0_34], %45 {strides = array<i32>} : memref<128x128xf32, #tpu.memory_space<vmem>>, vector<128x128xf32>,
    %c0_35 = arith.constant 0 : index
    %c0_36 = arith.constant 0 : index
    %47 = vector.load %arg11[%c0_35, %c0_36] : memref<128x128xbf16, #tpu.memory_space<vmem>>, vector<128x128xbf16>
    %cst_37 = arith.constant dense<0.000000e+00> : vector<128x128xf32>
    %48 = tpu.matmul %33, %47, %cst_37 {dimension_numbers = #tpu.dot_dimension_numbers<[1], [0], [0], [1], [0, 0, 1, 1], [], []>} : vector<128x128xbf16>, vector<128x128xbf16>, vector<128x128xf32> -> vector<128x128xf32>
    %c0_38 = arith.constant 0 : index
    %c0_39 = arith.constant 0 : index
    %49 = vector.load %arg12[%c0_38, %c0_39] : memref<1x128xf32, #tpu.memory_space<vmem>>, vector<1x128xf32>
    %50 = vector.broadcast %49 : vector<1x128xf32> to vector<128x128xf32>
    %51 = arith.addf %48, %50 : vector<128x128xf32>
    %52 = tpu.iota {dimensions = array<i32: 0>} : vector<128x1xi32>
    %c64_i32 = arith.constant 64 : i32
    %53 = vector.broadcast %c64_i32 : i32 to vector<128x1xi32>
    %54 = arith.cmpi slt, %52, %53 : vector<128x1xi32>
    %55 = arith.extui %54 : vector<128x1xi1> to vector<128x1xi32>
    %56 = arith.sitofp %55 : vector<128x1xi32> to vector<128x1xf32>
    %57 = vector.broadcast %56 : vector<128x1xf32> to vector<128x128xf32>
    %58 = arith.mulf %51, %57 : vector<128x128xf32>
    %cst_40 = arith.constant dense<0.000000e+00> : vector<128xf32>
    %59 = vector.multi_reduction <add>, %58, %cst_40 [0] : vector<128x128xf32> to vector<128xf32>
    %60 = vector.shape_cast %59 : vector<128xf32> to vector<1x128xf32>
    %61 = arith.mulf %58, %58 : vector<128x128xf32>
    %cst_41 = arith.constant dense<0.000000e+00> : vector<128xf32>
    %62 = vector.multi_reduction <add>, %61, %cst_41 [0] : vector<128x128xf32> to vector<128xf32>
    %63 = vector.shape_cast %62 : vector<128xf32> to vector<1x128xf32>
    %cst_42 = arith.constant 1.562500e-02 : f32
    %64 = vector.broadcast %cst_42 : f32 to vector<1x128xf32>
    %65 = arith.mulf %60, %64 : vector<1x128xf32>
    %cst_43 = arith.constant 1.562500e-02 : f32
    %66 = vector.broadcast %cst_43 : f32 to vector<1x128xf32>
    %67 = arith.mulf %63, %66 : vector<1x128xf32>
    %68 = arith.mulf %65, %65 : vector<1x128xf32>
    %69 = arith.subf %67, %68 : vector<1x128xf32>
    %cst_44 = arith.constant 0.000000e+00 : f32
    %70 = vector.broadcast %cst_44 : f32 to vector<1x128xf32>
    %71 = arith.maximumf %69, %70 : vector<1x128xf32>
    %72 = vector.broadcast %65 : vector<1x128xf32> to vector<128x128xf32>
    %73 = arith.subf %51, %72 : vector<128x128xf32>
    %cst_45 = arith.constant 9.99999974E-6 : f32
    %74 = vector.broadcast %cst_45 : f32 to vector<1x128xf32>
    %75 = arith.addf %71, %74 : vector<1x128xf32>
    %76 = math.rsqrt %75 : vector<1x128xf32>
    %77 = vector.broadcast %76 : vector<1x128xf32> to vector<128x128xf32>
    %78 = arith.mulf %73, %77 : vector<128x128xf32>
    %c0_46 = arith.constant 0 : index
    %c0_47 = arith.constant 0 : index
    %79 = vector.load %arg13[%c0_46, %c0_47] : memref<1x128xf32, #tpu.memory_space<vmem>>, vector<1x128xf32>
    %80 = vector.broadcast %79 : vector<1x128xf32> to vector<128x128xf32>
    %81 = arith.mulf %78, %80 : vector<128x128xf32>
    %c0_48 = arith.constant 0 : index
    %c0_49 = arith.constant 0 : index
    %82 = vector.load %arg14[%c0_48, %c0_49] : memref<1x128xf32, #tpu.memory_space<vmem>>, vector<1x128xf32>
    %83 = vector.broadcast %82 : vector<1x128xf32> to vector<128x128xf32>
    %84 = arith.addf %81, %83 : vector<128x128xf32>
    %cst_50 = arith.constant 0.000000e+00 : f32
    %85 = vector.broadcast %cst_50 : f32 to vector<128x128xf32>
    %86 = arith.cmpf ogt, %84, %85 : vector<128x128xf32>
    %cst_51 = arith.constant 0.00999999977 : f32
    %87 = vector.broadcast %cst_51 : f32 to vector<128x128xf32>
    %88 = arith.mulf %87, %84 : vector<128x128xf32>
    %89 = arith.select %86, %84, %88 : vector<128x128xi1>, vector<128x128xf32>
    %90 = arith.truncf %89 : vector<128x128xf32> to vector<128x128xbf16>
    %c0_52 = arith.constant 0 : index
    %c0_53 = arith.constant 0 : index
    %91 = vector.load %arg15[%c0_52, %c0_53] : memref<128x128xbf16, #tpu.memory_space<vmem>>, vector<128x128xbf16>
    %cst_54 = arith.constant dense<0.000000e+00> : vector<128x128xf32>
    %92 = tpu.matmul %90, %91, %cst_54 {dimension_numbers = #tpu.dot_dimension_numbers<[1], [0], [0], [1], [0, 0, 1, 1], [], []>} : vector<128x128xbf16>, vector<128x128xbf16>, vector<128x128xf32> -> vector<128x128xf32>
    %c0_55 = arith.constant 0 : index
    %c0_56 = arith.constant 0 : index
    %93 = vector.load %arg16[%c0_55, %c0_56] : memref<1x128xf32, #tpu.memory_space<vmem>>, vector<1x128xf32>
    %94 = vector.broadcast %93 : vector<1x128xf32> to vector<128x128xf32>
    %95 = arith.addf %92, %94 : vector<128x128xf32>
    %c0_57 = arith.constant 0 : index
    %c0_58 = arith.constant 0 : index
    %96 = vector.load %arg19[%c0_57, %c0_58] : memref<128x128xf32, #tpu.memory_space<vmem>>, vector<128x128xf32>
    tpu.vector_store %arg19[%c0_57, %c0_58], %95 {strides = array<i32>} : memref<128x128xf32, #tpu.memory_space<vmem>>, vector<128x128xf32>,
    return
  }
}

</mosaic_0001>

<bundles_post_ra>
// kernel: model_forward.1
= control target key start
LH: loop header
LB: loop body
LE: loop exit
PB: predicated region body
PF: predicated region fallthrough
CT: control target
= control target key end

     0   :  { %s2903_s2 = inlined_call_operand.vmem [shape: bf16[128,128], index: 2, kind: input, shape index: {}]   ;;  %s2904_s4 = inlined_call_operand.vmem [shape: bf16[128,128], index: 4, kind: input, shape index: {}]   ;;  %s2905_s3 = inlined_call_operand.vmem [shape: bf16[128,128], index: 3, kind: input, shape index: {}]   ;;  %s2906_s1 = inlined_call_operand.vmem [shape: bf16[128,128], index: 1, kind: input, shape index: {}]   ;;  %s2907_s5 = inlined_call_operand.vmem [shape: f32[1,128], index: 5, kind: input, shape index: {}]   ;;  %s2908_s7 = inlined_call_operand.vmem [shape: bf16[128,128], index: 7, kind: input, shape index: {}]   ;;  %s2909_s6 = inlined_call_operand.vmem [shape: bf16[128,128], index: 6, kind: input, shape index: {}]   ;;  %s2910_s11 = inlined_call_operand.vmem [shape: bf16[128,128], index: 11, kind: input, shape index: {}]   ;;  %s2911_s8 = inlined_call_operand.vmem [shape: f32[1,128], index: 8, kind: input, shape index: {}]   ;;  %s2912_s9 = inlined_call_operand.vmem [shape: bf16[128,128], index: 9, kind: input, shape index: {}]   ;;  %s2913_s10 = inlined_call_operand.vmem [shape: f32[1,128], index: 10, kind: input, shape index: {}]   ;;  %s2914_s17 = inlined_call_operand.vmem [shape: f32[128,128], index: 17, kind: output, shape index: {0}]   ;;  %s2915_s12 = inlined_call_operand.vmem [shape: f32[1,128], index: 12, kind: input, shape index: {}]   ;;  %s2916_s0 = inlined_call_operand.<no memory space> [shape: f32[1], index: 0, kind: input, shape index: {}]   ;;  %s2917_s13 = inlined_call_operand.vmem [shape: f32[1,128], index: 13, kind: input, shape index: {}]   ;;  %s2918_s14 = inlined_call_operand.vmem [shape: f32[1,128], index: 14, kind: input, shape index: {}]   ;;  %s2919_s18 = inlined_call_operand.vmem [shape: f32[128,128], index: 18, kind: output, shape index: {1}]   ;;  %s2920_s15 = inlined_call_operand.vmem [shape: bf16[128,128], index: 15, kind: input, shape index: {}]   ;;  %s2921_s16 = inlined_call_operand.vmem [shape: f32[1,128], index: 16, kind: input, shape index: {}]   ;;  %s2922_s19 = inlined_call_operand.vmem [shape: f32[128,128], index: 19, kind: output, shape index: {2}]  }
   0x1   :  { %2927 = sst [smem:[#allocation3_spill]] %s2903_s2  ;;  %v1985_v51 = vld [vmem:[%s2908_s7 + $0x38] sm:$0xff]  ;;  %v1984_v52 = vld [vmem:[%s2908_s7 + $0x30] sm:$0xff]  ;;  %v1983_v53 = vld [vmem:[%s2908_s7 + $0x28] sm:$0xff] }
   0x2   :  { %2928 = sst [smem:[#allocation4_spill]] %s2904_s4  ;;  %v1982_v55 = vld [vmem:[%s2908_s7 + $0x20] sm:$0xff]  ;;  %v1981_v58 = vld [vmem:[%s2908_s7 + $0x18] sm:$0xff]  ;;  %v1980_v60 = vld [vmem:[%s2908_s7 + $0x10] sm:$0xff] }
   0x3   :  { %2929 = sst [smem:[#allocation5_spill]] %s2905_s3  ;;  %v1979_v62 = vld [vmem:[%s2908_s7 + $0x8] sm:$0xff] }
   0x4   :  { %2930 = sst [smem:[#allocation6_spill]] %s2906_s1 }
   0x5   :  { %s2931_s20 = sld [smem:[#allocation3_spill]] }
   0x6   :  { %s2932_s22 = sld [smem:[#allocation4_spill]] }
   0x7   :  { %s2933_s24 = sld [smem:[#allocation5_spill]] }
   0x8   :  { %s2934_s26 = sld [smem:[#allocation6_spill]] }
   0xb   :  { %v2146_v0 = vld [vmem:[%s2931_s20 + $0x38] sm:$0xff]  ;;  %v2152_v1 = vld [vmem:[%s2931_s20 + $0x30] sm:$0xff]  ;;  %v2161_v2 = vld [vmem:[%s2931_s20 + $0x28] sm:$0xff] }
   0xc   :  { %188 = vmatpush.bf16.msra.mxu0 %v2146_v0  ;;  %2010 = vmatpush.bf16.msra.mxu1 %v2146_v0  ;;  %v2170_v3 = vld [vmem:[%s2931_s20 + $0x20] sm:$0xff]  ;;  %v2179_v4 = vld [vmem:[%s2931_s20 + $0x18] sm:$0xff]  ;;  %v2188_v5 = vld [vmem:[%s2931_s20 + $0x10] sm:$0xff] }
   0xd   :  { %2011 = vmatpush.bf16.msra.mxu2 %v2146_v0  ;;  %2012 = vmatpush.bf16.msra.mxu3 %v2146_v0  ;;  %v2197_v6 = vld [vmem:[%s2931_s20 + $0x8] sm:$0xff]  ;;  %v1946_v7 = vld [vmem:[%s2931_s20] sm:$0xff]  ;;  %v1969_v8 = vld [vmem:[%s2932_s22 + $0x38] sm:$0xff] }
   0xe   :  { %v1961_v9 = vld [vmem:[%s2933_s24 + $0x38] sm:$0xff]  ;;  %v2218_v10 = vld [vmem:[%s2934_s26] sm:$0xff]  ;;  %v2223_v11 = vld [vmem:[%s2934_s26 + $0x10] sm:$0xff] }
   0xf   :  { %v2228_v12 = vld [vmem:[%s2934_s26 + $0x20] sm:$0xff]  ;;  %v2233_v13 = vld [vmem:[%s2934_s26 + $0x30] sm:$0xff]  ;;  %v1967_v16 = vld [vmem:[%s2932_s22 + $0x28] sm:$0xff] }
  0x10   :  { %189 = vmatpush.bf16.msra.mxu0 %v2152_v1  ;;  %2013 = vmatpush.bf16.msra.mxu1 %v2152_v1  ;;  %v1968_v14 = vld [vmem:[%s2932_s22 + $0x30] sm:$0xff]  ;;  %v1959_v17 = vld [vmem:[%s2933_s24 + $0x28] sm:$0xff]  ;;  %v1966_v18 = vld [vmem:[%s2932_s22 + $0x20] sm:$0xff] }
  0x11   :  { %2014 = vmatpush.bf16.msra.mxu2 %v2152_v1  ;;  %2015 = vmatpush.bf16.msra.mxu3 %v2152_v1  ;;  %v1960_v15 = vld [vmem:[%s2933_s24 + $0x30] sm:$0xff]  ;;  %v1958_v19 = vld [vmem:[%s2933_s24 + $0x20] sm:$0xff]  ;;  %v1965_v20 = vld [vmem:[%s2932_s22 + $0x18] sm:$0xff] }
  0x12   :  { %v1957_v21 = vld [vmem:[%s2933_s24 + $0x18] sm:$0xff]  ;;  %v2266_v22 = vld [vmem:[%s2934_s26 + $0x8] sm:$0xff]  ;;  %v1964_v26 = vld [vmem:[%s2932_s22 + $0x10] sm:$0xff] }
  0x13   :  { %v2271_v23 = vld [vmem:[%s2934_s26 + $0x18] sm:$0xff]  ;;  %v2276_v24 = vld [vmem:[%s2934_s26 + $0x28] sm:$0xff]  ;;  %v1956_v27 = vld [vmem:[%s2933_s24 + $0x10] sm:$0xff] }
  0x14   :  { %190 = vmatpush.bf16.msra.mxu0 %v2161_v2  ;;  %2016 = vmatpush.bf16.msra.mxu1 %v2161_v2  ;;  %v2281_v25 = vld [vmem:[%s2934_s26 + $0x38] sm:$0xff]  ;;  %v1963_v28 = vld [vmem:[%s2932_s22 + $0x8] sm:$0xff]  ;;  %v1962_v30 = vld [vmem:[%s2932_s22] sm:$0xff] }
  0x15   :  { %2017 = vmatpush.bf16.msra.mxu2 %v2161_v2  ;;  %2018 = vmatpush.bf16.msra.mxu3 %v2161_v2  ;;  %v1955_v29 = vld [vmem:[%s2933_s24 + $0x8] sm:$0xff]  ;;  %v1954_v31 = vld [vmem:[%s2933_s24] sm:$0xff] }
  0x18   :  { %191 = vmatpush.bf16.msra.mxu0 %v2170_v3  ;;  %2019 = vmatpush.bf16.msra.mxu1 %v2170_v3 }
  0x19   :  { %2020 = vmatpush.bf16.msra.mxu2 %v2170_v3  ;;  %2021 = vmatpush.bf16.msra.mxu3 %v2170_v3 }
  0x1c   :  { %192 = vmatpush.bf16.msra.mxu0 %v2179_v4  ;;  %2022 = vmatpush.bf16.msra.mxu1 %v2179_v4 }
  0x1d   :  { %2023 = vmatpush.bf16.msra.mxu2 %v2179_v4  ;;  %2024 = vmatpush.bf16.msra.mxu3 %v2179_v4 }
  0x20   :  { %193 = vmatpush.bf16.msra.mxu0 %v2188_v5  ;;  %2025 = vmatpush.bf16.msra.mxu1 %v2188_v5 }
  0x21   :  { %2026 = vmatpush.bf16.msra.mxu2 %v2188_v5  ;;  %2027 = vmatpush.bf16.msra.mxu3 %v2188_v5 }
  0x24   :  { %194 = vmatpush.bf16.msra.mxu0 %v2197_v6  ;;  %2028 = vmatpush.bf16.msra.mxu1 %v2197_v6 }
  0x25   :  { %2029 = vmatpush.bf16.msra.mxu2 %v2197_v6  ;;  %2030 = vmatpush.bf16.msra.mxu3 %v2197_v6 }
  0x28   :  { %195 = vmatpush.bf16.msra.mxu0 %v1946_v7  ;;  %2031 = vmatpush.bf16.msra.mxu1 %v1946_v7 }
  0x29   :  { %2032 = vmatpush.bf16.msra.mxu2 %v1946_v7  ;;  %2033 = vmatpush.bf16.msra.mxu3 %v1946_v7 }
  0x2b   :  { %196 = vmatmul.bf16.vlgmr.msra.gmra.mxu0 %v2218_v10  ;;  %206 = vmatmul.bf16.vlgmr.msra.gmra.mxu1 %v2223_v11 }
  0x2c   :  { %325 = vmatpush.bf16.msrb.mxu1 %v1969_v8  ;;  %216 = vmatmul.bf16.vlgmr.msra.gmra.mxu2 %v2228_v12 }
  0x2d   :  { %422 = vmatpush.bf16.msrb.mxu2 %v1961_v9  ;;  %226 = vmatmul.bf16.vlgmr.msra.gmra.mxu3 %v2233_v13 }
  0x2e   :  { %684 = vmatpush.bf16.msrb.mxu0 %v1985_v51 }
  0x30   :  { %326 = vmatpush.bf16.msrb.mxu1 %v1968_v14 }
  0x31   :  { %423 = vmatpush.bf16.msrb.mxu2 %v1960_v15 }
  0x32   :  { %685 = vmatpush.bf16.msrb.mxu0 %v1984_v52 }
  0x34   :  { %327 = vmatpush.bf16.msrb.mxu1 %v1967_v16 }
  0x35   :  { %424 = vmatpush.bf16.msrb.mxu2 %v1959_v17 }
  0x36   :  { %686 = vmatpush.bf16.msrb.mxu0 %v1983_v53 }
  0x38   :  { %328 = vmatpush.bf16.msrb.mxu1 %v1966_v18 }
  0x39   :  { %425 = vmatpush.bf16.msrb.mxu2 %v1958_v19 }
  0x3a   :  { %687 = vmatpush.bf16.msrb.mxu0 %v1982_v55 }
  0x3b   :  { %201 = vmatmul.bf16.gmra.mxu0 %v2266_v22  ;;  %211 = vmatmul.bf16.gmra.mxu1 %v2271_v23 }
  0x3c   :  { %329 = vmatpush.bf16.msrb.mxu1 %v1965_v20  ;;  %221 = vmatmul.bf16.gmra.mxu2 %v2276_v24 }
  0x3d   :  { %426 = vmatpush.bf16.msrb.mxu2 %v1957_v21  ;;  %231 = vmatmul.bf16.gmra.mxu3 %v2281_v25 }
  0x3e   :  { %688 = vmatpush.bf16.msrb.mxu0 %v1981_v58 }
  0x40   :  { %330 = vmatpush.bf16.msrb.mxu1 %v1964_v26 }
  0x41   :  { %427 = vmatpush.bf16.msrb.mxu2 %v1956_v27 }
  0x42   :  { %689 = vmatpush.bf16.msrb.mxu0 %v1980_v60 }
  0x44   :  { %331 = vmatpush.bf16.msrb.mxu1 %v1963_v28 }
  0x45   :  { %428 = vmatpush.bf16.msrb.mxu2 %v1955_v29 }
  0x46   :  { %690 = vmatpush.bf16.msrb.mxu0 %v1979_v62 }
  0x48   :  { %332 = vmatpush.bf16.msrb.mxu1 %v1962_v30 }
  0x49   :  { %429 = vmatpush.bf16.msrb.mxu2 %v1954_v31 }
  0x4b   :  { %333 = vmatmul.bf16.vlgmr.msrb.gmra.mxu1 %v1946_v7 }
  0x5b   :  { %338 = vmatmul.bf16.gmra.mxu1 %v2197_v6  ;;  %v2339_v6 = vld [vmem:[%s2907_s5] ss:$0 sm:$0xff] }
  0x6b   :  { %343 = vmatmul.bf16.gmra.mxu1 %v2188_v5 }
  0x7b   :  { %348 = vmatmul.bf16.gmra.mxu1 %v2179_v4 }
  0x8b   :  { %353 = vmatmul.bf16.gmra.mxu1 %v2170_v3 }
  0x9b   :  { %358 = vmatmul.bf16.gmra.mxu1 %v2161_v2 }
  0xa8   :  { %v197_v32 = vpop.f32.mrf.mxu0  ;;  %v207_v37 = vpop.f32.mrf.mxu1 }
  0xab   :  { %363 = vmatmul.bf16.gmra.mxu1 %v2152_v1  ;;  %v1978_v1 = vld [vmem:[%s2908_s7] sm:$0xff] }
  0xac   :  { %691 = vmatpush.bf16.msrb.mxu0 %v1978_v1 }
  0xaf   :  { %v217_v43 = vpop.f32.mrf.mxu2 }
  0xb0   :  { %v199_v33 = vpop.f32.mrf.mxu0  ;;  %v209_v39 = vpop.f32.mrf.mxu1 }
  0xb1   :  { %v237_v34 = vpack.c.bf16 %v199_v33, %v197_v32  ;;  %v239_v40 = vpack.c.bf16 %v209_v39, %v207_v37  ;;  %v227_v49 = vpop.f32.mrf.mxu3 }
  0xb3   :  { %430 = vmatmul.bf16.vlgmr.msrb.gmra.mxu2 %v237_v34 }
  0xb7   :  { %v219_v45 = vpop.f32.mrf.mxu2 }
  0xb8   :  { %v202_v35 = vpop.f32.mrf.mxu0  ;;  %v212_v41 = vpop.f32.mrf.mxu1  ;;  %v241_v46 = vpack.c.bf16 %v219_v45, %v217_v43 }
  0xb9   :  { %v229_v54 = vpop.f32.mrf.mxu3 }
  0xba   :  { %v243_v56 = vpack.c.bf16 %v229_v54, %v227_v49 }
  0xbb   :  { %368 = vmatmul.bf16.gmra.mxu1 %v2146_v0 }
  0xbf   :  { %v222_v47 = vpop.f32.mrf.mxu2 }
  0xc0   :  { %v204_v36 = vpop.f32.mrf.mxu0  ;;  %v214_v42 = vpop.f32.mrf.mxu1 }
  0xc1   :  { %v238_v38 = vpack.c.bf16 %v204_v36, %v202_v35  ;;  %v240_v44 = vpack.c.bf16 %v214_v42, %v212_v41  ;;  %v232_v57 = vpop.f32.mrf.mxu3 }
  0xc3   :  { %435 = vmatmul.bf16.gmra.mxu2 %v238_v38 }
  0xc7   :  { %v224_v48 = vpop.f32.mrf.mxu2 }
  0xc8   :  { %v242_v50 = vpack.c.bf16 %v224_v48, %v222_v47  ;;  %v334_v59 = vpop.f32.mrf.mxu1 }
  0xc9   :  { %v234_v61 = vpop.f32.mrf.mxu3 }
  0xca   :  { %v244_v63 = vpack.c.bf16 %v234_v61, %v232_v57 }
  0xd0   :  { %v336_v0 = vpop.f32.mrf.mxu1 }
  0xd3   :  { %440 = vmatmul.bf16.gmra.mxu2 %v239_v40 }
  0xd8   :  { %v339_v2 = vpop.f32.mrf.mxu1 }
  0xe0   :  { %v341_v4 = vpop.f32.mrf.mxu1 }
  0xe3   :  { %445 = vmatmul.bf16.gmra.mxu2 %v240_v44 }
  0xe8   :  { %v344_v14 = vpop.f32.mrf.mxu1 }
  0xf0   :  { %v346_v27 = vpop.f32.mrf.mxu1 }
  0xf3   :  { %450 = vmatmul.bf16.gmra.mxu2 %v241_v46 }
  0xf8   :  { %v349_v34 = vpop.f32.mrf.mxu1 }
 0x100   :  { %v351_v42 = vpop.f32.mrf.mxu1 }
 0x103   :  { %455 = vmatmul.bf16.gmra.mxu2 %v242_v50 }
 0x108   :  { %v354_v51 = vpop.f32.mrf.mxu1 }
 0x110   :  { %v356_v58 = vpop.f32.mrf.mxu1 }
 0x113   :  { %460 = vmatmul.bf16.gmra.mxu2 %v243_v56 }
 0x118   :  { %v359_v1 = vpop.f32.mrf.mxu1 }
 0x123   :  { %465 = vmatmul.bf16.gmra.mxu2 %v244_v63 }
 0x136   :  { %v431_v3 = vpop.f32.mrf.mxu2 }
 0x137   :  { %v432_v5 = vadd.f32 %v431_v3, %v334_v59 }
 0x139   :  { %v475_v7 = vadd.f32 %v2339_v6, %v432_v5 }
 0x13b   :  { %v507_v15 = vmul.f32 0.5, %v475_v7  ;;  %vm491_vm0 = vcmp.gt.f32.partialorder %v475_v7, 0.0 }
 0x13d   :  { %v523_v18 = vsel %vm491_vm0, %v475_v7, %v507_v15  ;;  %v361_v15 = vpop.f32.mrf.mxu1 }
 0x13e   :  { %v433_v8 = vpop.f32.mrf.mxu2 }
 0x13f   :  { %v434_v9 = vadd.f32 %v433_v8, %v336_v0 }
 0x141   :  { %v476_v16 = vadd.f32 %v2339_v6, %v434_v9 }
 0x143   :  { %v508_v17 = vmul.f32 0.5, %v476_v16  ;;  %vm492_vm1 = vcmp.gt.f32.partialorder %v476_v16, 0.0 }
 0x145   :  { %v524_v19 = vsel %vm492_vm1, %v476_v16, %v508_v17 }
 0x146   :  { %v436_v20 = vpop.f32.mrf.mxu2  ;;  %v2343_v21 = vpack.c.bf16 %v524_v19, %v523_v18 }
 0x147   :  { %v437_v26 = vadd.f32 %v436_v20, %v339_v2 }
 0x148   :  { %692 = vmatmul.bf16.vlgmr.msrb.gmra.mxu0 %v2343_v21 }
 0x149   :  { %v477_v28 = vadd.f32 %v2339_v6, %v437_v26 }
 0x14b   :  { %v509_v32 = vmul.f32 0.5, %v477_v28  ;;  %vm493_vm2 = vcmp.gt.f32.partialorder %v477_v28, 0.0 }
 0x14d   :  { %v525_v35 = vsel %vm493_vm2, %v477_v28, %v509_v32 }
 0x14e   :  { %v438_v29 = vpop.f32.mrf.mxu2 }
 0x14f   :  { %v439_v30 = vadd.f32 %v438_v29, %v341_v4 }
 0x151   :  { %v478_v31 = vadd.f32 %v2339_v6, %v439_v30 }
 0x153   :  { %vm494_vm3 = vcmp.gt.f32.partialorder %v478_v31, 0.0  ;;  %v510_v33 = vmul.f32 0.5, %v478_v31 }
 0x155   :  { %v526_v36 = vsel %vm494_vm3, %v478_v31, %v510_v33 }
 0x156   :  { %v441_v37 = vpop.f32.mrf.mxu2  ;;  %v2348_v38 = vpack.c.bf16 %v526_v36, %v525_v35 }
 0x157   :  { %v442_v39 = vadd.f32 %v441_v37, %v344_v14 }
 0x158   :  { %697 = vmatmul.bf16.gmra.mxu0 %v2348_v38 }
 0x159   :  { %v479_v40 = vadd.f32 %v2339_v6, %v442_v39 }
 0x15b   :  { %v511_v45 = vmul.f32 0.5, %v479_v40  ;;  %vm495_vm4 = vcmp.gt.f32.partialorder %v479_v40, 0.0 }
 0x15d   :  { %v527_v47 = vsel %vm495_vm4, %v479_v40, %v511_v45 }
 0x15e   :  { %v443_v41 = vpop.f32.mrf.mxu2 }
 0x15f   :  { %v444_v43 = vadd.f32 %v443_v41, %v346_v27  ;;  %v364_v27 = vpop.f32.mrf.mxu1 }
 0x161   :  { %v480_v44 = vadd.f32 %v2339_v6, %v444_v43 }
 0x163   :  { %vm496_vm5 = vcmp.gt.f32.partialorder %v480_v44, 0.0  ;;  %v512_v46 = vmul.f32 0.5, %v480_v44 }
 0x165   :  { %v528_v48 = vsel %vm496_vm5, %v480_v44, %v512_v46 }
 0x166   :  { %v446_v49 = vpop.f32.mrf.mxu2  ;;  %v2353_v50 = vpack.c.bf16 %v528_v48, %v527_v47 }
 0x167   :  { %v447_v52 = vadd.f32 %v446_v49, %v349_v34  ;;  %v366_v36 = vpop.f32.mrf.mxu1 }
 0x168   :  { %702 = vmatmul.bf16.gmra.mxu0 %v2353_v50 }
 0x169   :  { %v481_v53 = vadd.f32 %v2339_v6, %v447_v52 }
 0x16b   :  { %v513_v57 = vmul.f32 0.5, %v481_v53  ;;  %vm497_vm6 = vcmp.gt.f32.partialorder %v481_v53, 0.0 }
 0x16d   :  { %v529_v60 = vsel %vm497_vm6, %v481_v53, %v513_v57 }
 0x16e   :  { %v448_v54 = vpop.f32.mrf.mxu2 }
 0x16f   :  { %v449_v55 = vadd.f32 %v448_v54, %v351_v42  ;;  %v369_v44 = vpop.f32.mrf.mxu1 }
 0x171   :  { %v482_v56 = vadd.f32 %v2339_v6, %v449_v55 }
 0x173   :  { %vm498_vm7 = vcmp.gt.f32.partialorder %v482_v56, 0.0  ;;  %v514_v59 = vmul.f32 0.5, %v482_v56 }
 0x175   :  { %v530_v61 = vsel %vm498_vm7, %v482_v56, %v514_v59 }
 0x176   :  { %v451_v62 = vpop.f32.mrf.mxu2  ;;  %v2358_v63 = vpack.c.bf16 %v530_v61, %v529_v60  ;;  %v1977_v61 = vld [vmem:[%s2909_s6 + $0x38] sm:$0xff] }
 0x177   :  { %v452_v0 = vadd.f32 %v451_v62, %v354_v51  ;;  %v371_v52 = vpop.f32.mrf.mxu1  ;;  %781 = vmatpush.bf16.msra.mxu1 %v1977_v61  ;;  %v1975_v62 = vld [vmem:[%s2909_s6 + $0x28] sm:$0xff] }
 0x178   :  { %707 = vmatmul.bf16.gmra.mxu0 %v2358_v63 }
 0x179   :  { %v483_v2 = vadd.f32 %v2339_v6, %v452_v0 }
 0x17b   :  { %v515_v7 = vmul.f32 0.5, %v483_v2  ;;  %vm499_vm8 = vcmp.gt.f32.partialorder %v483_v2, 0.0 }
 0x17d   :  { %v531_v9 = vsel %vm499_vm8, %v483_v2, %v515_v7 }
 0x17e   :  { %v453_v3 = vpop.f32.mrf.mxu2 }
 0x17f   :  { %v454_v4 = vadd.f32 %v453_v3, %v356_v58 }
 0x181   :  { %v484_v5 = vadd.f32 %v2339_v6, %v454_v4 }
 0x183   :  { %vm500_vm9 = vcmp.gt.f32.partialorder %v484_v5, 0.0  ;;  %v516_v8 = vmul.f32 0.5, %v484_v5 }
 0x185   :  { %v532_v14 = vsel %vm500_vm9, %v484_v5, %v516_v8  ;;  %v1998_v5 = vld [vmem:[%s2910_s11 + $0x20] sm:$0xff] }
 0x186   :  { %v456_v16 = vpop.f32.mrf.mxu2  ;;  %v543_v17 = vpack.c.bf16 %v532_v14, %v531_v9  ;;  %v1997_v14 = vld [vmem:[%s2910_s11 + $0x18] sm:$0xff] }
 0x187   :  { %v457_v18 = vadd.f32 %v456_v16, %v359_v1 }
 0x188   :  { %712 = vmatmul.bf16.gmra.mxu0 %v543_v17 }
 0x189   :  { %v485_v19 = vadd.f32 %v2339_v6, %v457_v18  ;;  %v1996_v18 = vld [vmem:[%s2910_s11 + $0x10] sm:$0xff] }
 0x18b   :  { %v517_v29 = vmul.f32 0.5, %v485_v19  ;;  %vm501_vm10 = vcmp.gt.f32.partialorder %v485_v19, 0.0 }
 0x18d   :  { %v533_v31 = vsel %vm501_vm10, %v485_v19, %v517_v29  ;;  %v1992_v29 = vld [vmem:[%s2912_s9 + $0x30] sm:$0xff] }
 0x18e   :  { %v458_v20 = vpop.f32.mrf.mxu2 }
 0x18f   :  { %v459_v26 = vadd.f32 %v458_v20, %v361_v15 }
 0x191   :  { %v486_v28 = vadd.f32 %v2339_v6, %v459_v26 }
 0x193   :  { %vm502_vm11 = vcmp.gt.f32.partialorder %v486_v28, 0.0  ;;  %v518_v30 = vmul.f32 0.5, %v486_v28 }
 0x195   :  { %v534_v32 = vsel %vm502_vm11, %v486_v28, %v518_v30  ;;  %v1995_v28 = vld [vmem:[%s2910_s11 + $0x8] sm:$0xff] }
 0x196   :  { %v461_v33 = vpop.f32.mrf.mxu2  ;;  %v544_v34 = vpack.c.bf16 %v534_v32, %v533_v31  ;;  %v1991_v30 = vld [vmem:[%s2912_s9 + $0x28] sm:$0xff]  ;;  %v1990_v32 = vld [vmem:[%s2912_s9 + $0x20] sm:$0xff] }
 0x197   :  { %v462_v35 = vadd.f32 %v461_v33, %v364_v27  ;;  %v1993_v27 = vld [vmem:[%s2912_s9 + $0x38] sm:$0xff] }
 0x198   :  { %717 = vmatmul.bf16.gmra.mxu0 %v544_v34  ;;  %991 = vmatpush.bf16.msra.mxu2 %v1993_v27 }
 0x199   :  { %v487_v37 = vadd.f32 %v2339_v6, %v462_v35  ;;  %v1989_v35 = vld [vmem:[%s2912_s9 + $0x18] sm:$0xff] }
 0x19b   :  { %v519_v42 = vmul.f32 0.5, %v487_v37  ;;  %vm503_vm12 = vcmp.gt.f32.partialorder %v487_v37, 0.0 }
 0x19c   :  { %992 = vmatpush.bf16.msra.mxu2 %v1992_v29 }
 0x19d   :  { %v535_v45 = vsel %vm503_vm12, %v487_v37, %v519_v42  ;;  %v1988_v37 = vld [vmem:[%s2912_s9 + $0x10] sm:$0xff] }
 0x19e   :  { %v463_v39 = vpop.f32.mrf.mxu2 }
 0x19f   :  { %v464_v40 = vadd.f32 %v463_v39, %v366_v36 }
 0x1a0   :  { %993 = vmatpush.bf16.msra.mxu2 %v1991_v30 }
 0x1a1   :  { %v488_v41 = vadd.f32 %v2339_v6, %v464_v40  ;;  %v1994_v40 = vld [vmem:[%s2910_s11] sm:$0xff] }
 0x1a3   :  { %vm504_vm13 = vcmp.gt.f32.partialorder %v488_v41, 0.0  ;;  %v520_v43 = vmul.f32 0.5, %v488_v41 }
 0x1a4   :  { %994 = vmatpush.bf16.msra.mxu2 %v1990_v32 }
 0x1a5   :  { %v536_v46 = vsel %vm504_vm13, %v488_v41, %v520_v43  ;;  %v1987_v41 = vld [vmem:[%s2912_s9 + $0x8] sm:$0xff]  ;;  %v1986_v43 = vld [vmem:[%s2912_s9] sm:$0xff] }
 0x1a6   :  { %v466_v47 = vpop.f32.mrf.mxu2  ;;  %v545_v48 = vpack.c.bf16 %v536_v46, %v535_v45 }
 0x1a7   :  { %v467_v49 = vadd.f32 %v466_v47, %v369_v44  ;;  %v2456_v47 = vld [vmem:[%s2911_s8] ss:$0 sm:$0xff] }
 0x1a8   :  { %722 = vmatmul.bf16.gmra.mxu0 %v545_v48  ;;  %995 = vmatpush.bf16.msra.mxu2 %v1989_v35 }
 0x1a9   :  { %v489_v51 = vadd.f32 %v2339_v6, %v467_v49 }
 0x1ab   :  { %v521_v56 = vmul.f32 0.5, %v489_v51  ;;  %vm505_vm14 = vcmp.gt.f32.partialorder %v489_v51, 0.0 }
 0x1ac   :  { %996 = vmatpush.bf16.msra.mxu2 %v1988_v37 }
 0x1ad   :  { %v537_v58 = vsel %vm505_vm14, %v489_v51, %v521_v56 }
 0x1ae   :  { %v468_v53 = vpop.f32.mrf.mxu2 }
 0x1af   :  { %v469_v54 = vadd.f32 %v468_v53, %v371_v52 }
 0x1b0   :  { %997 = vmatpush.bf16.msra.mxu2 %v1987_v41 }
 0x1b1   :  { %v490_v55 = vadd.f32 %v2339_v6, %v469_v54  ;;  %v1976_v6 = vld [vmem:[%s2909_s6 + $0x30] sm:$0xff] }
 0x1b2   :  { %782 = vmatpush.bf16.msra.mxu1 %v1976_v6 }
 0x1b3   :  { %vm506_vm15 = vcmp.gt.f32.partialorder %v490_v55, 0.0  ;;  %v522_v57 = vmul.f32 0.5, %v490_v55 }
 0x1b4   :  { %998 = vmatpush.bf16.msra.mxu2 %v1986_v43 }
 0x1b5   :  { %v538_v59 = vsel %vm506_vm15, %v490_v55, %v522_v57 }
 0x1b6   :  { %v546_v60 = vpack.c.bf16 %v538_v59, %v537_v58  ;;  %783 = vmatpush.bf16.msra.mxu1 %v1975_v62 }
 0x1b8   :  { %547 = vmatpush.bf16.msrb.mxu3 %v546_v60  ;;  %727 = vmatmul.bf16.gmra.mxu0 %v546_v60 }
 0x1bc   :  { %548 = vmatpush.bf16.msrb.mxu3 %v545_v48 }
 0x1c0   :  { %549 = vmatpush.bf16.msrb.mxu3 %v544_v34 }
 0x1c4   :  { %550 = vmatpush.bf16.msrb.mxu3 %v543_v17 }
 0x1c5   :  { %v693_v36 = vpop.f32.mrf.mxu0 }
 0x1c8   :  { %551 = vmatpush.bf16.msrb.mxu3 %v2358_v63 }
 0x1cc   :  { %552 = vmatpush.bf16.msrb.mxu3 %v2353_v50 }
 0x1cd   :  { %v695_v42 = vpop.f32.mrf.mxu0 }
 0x1d0   :  { %553 = vmatpush.bf16.msrb.mxu3 %v2348_v38  ;;  %v1974_v38 = vld [vmem:[%s2909_s6 + $0x20] sm:$0xff] }
 0x1d1   :  { %784 = vmatpush.bf16.msra.mxu1 %v1974_v38 }
 0x1d4   :  { %554 = vmatpush.bf16.msrb.mxu3 %v2343_v21  ;;  %v1973_v21 = vld [vmem:[%s2909_s6 + $0x18] sm:$0xff] }
 0x1d5   :  { %785 = vmatpush.bf16.msra.mxu1 %v1973_v21  ;;  %v698_v46 = vpop.f32.mrf.mxu0 }
 0x1d7   :  { %555 = vmatmul.bf16.vlgmr.msrb.gmra.mxu3 %v2218_v10  ;;  %v1972_v10 = vld [vmem:[%s2909_s6 + $0x10] sm:$0xff] }
 0x1d9   :  { %786 = vmatpush.bf16.msra.mxu1 %v1972_v10 }
 0x1dd   :  { %v700_v48 = vpop.f32.mrf.mxu0 }
 0x1e5   :  { %v703_v57 = vpop.f32.mrf.mxu0 }
 0x1e7   :  { %560 = vmatmul.bf16.gmra.mxu3 %v2266_v22  ;;  %v1971_v22 = vld [vmem:[%s2909_s6 + $0x8] sm:$0xff] }
 0x1e8   :  { %787 = vmatpush.bf16.msra.mxu1 %v1971_v22 }
 0x1ed   :  { %v705_v21 = vpop.f32.mrf.mxu0 }
 0x1f7   :  { %565 = vmatmul.bf16.gmra.mxu3 %v2223_v11  ;;  %v1970_v11 = vld [vmem:[%s2909_s6] sm:$0xff] }
 0x1f8   :  { %788 = vmatpush.bf16.msra.mxu1 %v1970_v11 }
 0x207   :  { %570 = vmatmul.bf16.gmra.mxu3 %v2271_v23 }
 0x217   :  { %575 = vmatmul.bf16.gmra.mxu3 %v2228_v12  ;;  %v2001_v12 = vld [vmem:[%s2910_s11 + $0x38] sm:$0xff] }
 0x218   :  { %1173 = vmatpush.bf16.msra.mxu3 %v2001_v12 }
 0x227   :  { %580 = vmatmul.bf16.gmra.mxu3 %v2276_v24  ;;  %v2000_v24 = vld [vmem:[%s2910_s11 + $0x30] sm:$0xff] }
 0x228   :  { %1174 = vmatpush.bf16.msra.mxu3 %v2000_v24 }
 0x237   :  { %585 = vmatmul.bf16.gmra.mxu3 %v2233_v13  ;;  %v1999_v13 = vld [vmem:[%s2910_s11 + $0x28] sm:$0xff] }
 0x238   :  { %1175 = vmatpush.bf16.msra.mxu3 %v1999_v13 }
 0x23c   :  { %1176 = vmatpush.bf16.msra.mxu3 %v1998_v5 }
 0x240   :  { %1177 = vmatpush.bf16.msra.mxu3 %v1997_v14 }
 0x244   :  { %1178 = vmatpush.bf16.msra.mxu3 %v1996_v18 }
 0x247   :  { %590 = vmatmul.bf16.gmra.mxu3 %v2281_v25 }
 0x248   :  { %1179 = vmatpush.bf16.msra.mxu3 %v1995_v28 }
 0x24c   :  { %1180 = vmatpush.bf16.msra.mxu3 %v1994_v40 }
 0x25a   :  { %v556_v23 = vpop.f32.mrf.mxu3 }
 0x262   :  { %v558_v50 = vpop.f32.mrf.mxu3 }
 0x263   :  { %v596_v63 = vpack.c.bf16 %v558_v50, %v556_v23 }
 0x265   :  { %789 = vmatmul.bf16.vlgmr.msra.gmra.mxu1 %v596_v63  ;;  %v708_v63 = vpop.f32.mrf.mxu0 }
 0x26a   :  { %v561_v0 = vpop.f32.mrf.mxu3 }
 0x272   :  { %v563_v1 = vpop.f32.mrf.mxu3 }
 0x273   :  { %v597_v2 = vpack.c.bf16 %v563_v1, %v561_v0 }
 0x275   :  { %794 = vmatmul.bf16.gmra.mxu1 %v597_v2 }
 0x27a   :  { %v566_v25 = vpop.f32.mrf.mxu3 }
 0x282   :  { %v568_v3 = vpop.f32.mrf.mxu3 }
 0x283   :  { %v598_v4 = vpack.c.bf16 %v568_v3, %v566_v25 }
 0x285   :  { %799 = vmatmul.bf16.gmra.mxu1 %v598_v4  ;;  %v710_v4 = vpop.f32.mrf.mxu0 }
 0x28a   :  { %v571_v7 = vpop.f32.mrf.mxu3 }
 0x28d   :  { %v713_v18 = vpop.f32.mrf.mxu0 }
 0x292   :  { %v573_v8 = vpop.f32.mrf.mxu3 }
 0x293   :  { %v599_v9 = vpack.c.bf16 %v573_v8, %v571_v7 }
 0x295   :  { %804 = vmatmul.bf16.gmra.mxu1 %v599_v9  ;;  %v715_v30 = vpop.f32.mrf.mxu0 }
 0x29a   :  { %v576_v15 = vpop.f32.mrf.mxu3 }
 0x2a2   :  { %v578_v16 = vpop.f32.mrf.mxu3 }
 0x2a3   :  { %v600_v17 = vpack.c.bf16 %v578_v16, %v576_v15 }
 0x2a5   :  { %809 = vmatmul.bf16.gmra.mxu1 %v600_v17 }
 0x2aa   :  { %v581_v19 = vpop.f32.mrf.mxu3 }
 0x2b2   :  { %v583_v20 = vpop.f32.mrf.mxu3 }
 0x2b3   :  { %v601_v26 = vpack.c.bf16 %v583_v20, %v581_v19 }
 0x2b5   :  { %814 = vmatmul.bf16.gmra.mxu1 %v601_v26 }
 0x2ba   :  { %v586_v31 = vpop.f32.mrf.mxu3 }
 0x2c2   :  { %v588_v33 = vpop.f32.mrf.mxu3 }
 0x2c3   :  { %v602_v34 = vpack.c.bf16 %v588_v33, %v586_v31 }
 0x2c5   :  { %819 = vmatmul.bf16.gmra.mxu1 %v602_v34 }
 0x2ca   :  { %v591_v39 = vpop.f32.mrf.mxu3 }
 0x2d2   :  { %v593_v44 = vpop.f32.mrf.mxu3 }
 0x2d3   :  { %v603_v45 = vpack.c.bf16 %v593_v44, %v591_v39  ;;  %v718_v39 = vpop.f32.mrf.mxu0 }
 0x2d5   :  { %824 = vmatmul.bf16.gmra.mxu1 %v603_v45 }
 0x2e2   :  { %v790_v49 = vpop.f32.mrf.mxu1 }
 0x2e3   :  { %v791_v51 = vadd.f32 %v790_v49, %v693_v36 }
 0x2e5   :  { %v834_v52 = vadd.f32 %v2456_v47, %v791_v51 }
 0x2e7   :  { %vm850_vm0 = vcmp.gt.f32.partialorder %v834_v52, 0.0  ;;  %v866_v53 = vmul.f32 0.5, %v834_v52 }
 0x2e9   :  { %v882_v54 = vsel %vm850_vm0, %v834_v52, %v866_v53 }
 0x2ea   :  { %906 = vst [vmem:[%s2914_s17] sm:$0xff] %v882_v54  ;;  %v792_v55 = vpop.f32.mrf.mxu1 }
 0x2eb   :  { %v793_v56 = vadd.f32 %v792_v55, %v695_v42 }
 0x2ed   :  { %v835_v58 = vadd.f32 %v2456_v47, %v793_v56 }
 0x2ef   :  { %vm851_vm1 = vcmp.gt.f32.partialorder %v835_v58, 0.0  ;;  %v867_v59 = vmul.f32 0.5, %v835_v58 }
 0x2f1   :  { %v883_v60 = vsel %vm851_vm1, %v835_v58, %v867_v59 }
 0x2f2   :  { %907 = vst [vmem:[%s2914_s17 + $0x8] sm:$0xff] %v883_v60  ;;  %v795_v61 = vpop.f32.mrf.mxu1  ;;  %v898_v6 = vpack.c.bf16 %v883_v60, %v882_v54 }
 0x2f3   :  { %v796_v62 = vadd.f32 %v795_v61, %v698_v46  ;;  %v720_v46 = vpop.f32.mrf.mxu0 }
 0x2f4   :  { %999 = vmatmul.bf16.vlgmr.msra.gmra.mxu2 %v898_v6  ;;  %1181 = vmatmul.bf16.vlgmr.msra.gmra.mxu3 %v898_v6 }
 0x2f5   :  { %v836_v38 = vadd.f32 %v2456_v47, %v796_v62 }
 0x2f7   :  { %vm852_vm2 = vcmp.gt.f32.partialorder %v836_v38, 0.0  ;;  %v868_v10 = vmul.f32 0.5, %v836_v38 }
 0x2f9   :  { %v884_v22 = vsel %vm852_vm2, %v836_v38, %v868_v10 }
 0x2fa   :  { %v797_v11 = vpop.f32.mrf.mxu1  ;;  %908 = vst [vmem:[%s2914_s17 + $0x10] sm:$0xff] %v884_v22 }
 0x2fb   :  { %v798_v12 = vadd.f32 %v797_v11, %v700_v48 }
 0x2fd   :  { %v837_v23 = vadd.f32 %v2456_v47, %v798_v12 }
 0x2ff   :  { %vm853_vm3 = vcmp.gt.f32.partialorder %v837_v23, 0.0  ;;  %v869_v50 = vmul.f32 0.5, %v837_v23 }
 0x301   :  { %v885_v24 = vsel %vm853_vm3, %v837_v23, %v869_v50 }
 0x302   :  { %v800_v0 = vpop.f32.mrf.mxu1  ;;  %v899_v1 = vpack.c.bf16 %v885_v24, %v884_v22  ;;  %909 = vst [vmem:[%s2914_s17 + $0x18] sm:$0xff] %v885_v24 }
 0x303   :  { %v801_v2 = vadd.f32 %v800_v0, %v703_v57  ;;  %v723_v57 = vpop.f32.mrf.mxu0 }
 0x304   :  { %1004 = vmatmul.bf16.gmra.mxu2 %v899_v1  ;;  %1186 = vmatmul.bf16.gmra.mxu3 %v899_v1 }
 0x305   :  { %v838_v13 = vadd.f32 %v2456_v47, %v801_v2 }
 0x307   :  { %vm854_vm4 = vcmp.gt.f32.partialorder %v838_v13, 0.0  ;;  %v870_v25 = vmul.f32 0.5, %v838_v13 }
 0x309   :  { %v886_v3 = vsel %vm854_vm4, %v838_v13, %v870_v25 }
 0x30a   :  { %v802_v5 = vpop.f32.mrf.mxu1  ;;  %910 = vst [vmem:[%s2914_s17 + $0x20] sm:$0xff] %v886_v3 }
 0x30b   :  { %v803_v7 = vadd.f32 %v802_v5, %v705_v21  ;;  %v725_v21 = vpop.f32.mrf.mxu0 }
 0x30d   :  { %v839_v8 = vadd.f32 %v2456_v47, %v803_v7 }
 0x30f   :  { %vm855_vm5 = vcmp.gt.f32.partialorder %v839_v8, 0.0  ;;  %v871_v9 = vmul.f32 0.5, %v839_v8 }
 0x311   :  { %v887_v14 = vsel %vm855_vm5, %v839_v8, %v871_v9 }
 0x312   :  { %v805_v15 = vpop.f32.mrf.mxu1  ;;  %v900_v16 = vpack.c.bf16 %v887_v14, %v886_v3  ;;  %911 = vst [vmem:[%s2914_s17 + $0x28] sm:$0xff] %v887_v14 }
 0x313   :  { %v806_v17 = vadd.f32 %v805_v15, %v708_v63  ;;  %v728_v63 = vpop.f32.mrf.mxu0 }
 0x314   :  { %1009 = vmatmul.bf16.gmra.mxu2 %v900_v16  ;;  %1191 = vmatmul.bf16.gmra.mxu3 %v900_v16  ;;  %v2525_v16 = vld [vmem:[%s2913_s10] ss:$0 sm:$0xff] }
 0x315   :  { %v840_v19 = vadd.f32 %v2456_v47, %v806_v17 }
 0x317   :  { %vm856_vm6 = vcmp.gt.f32.partialorder %v840_v19, 0.0  ;;  %v872_v20 = vmul.f32 0.5, %v840_v19 }
 0x319   :  { %v888_v26 = vsel %vm856_vm6, %v840_v19, %v872_v20 }
 0x31a   :  { %v807_v27 = vpop.f32.mrf.mxu1  ;;  %912 = vst [vmem:[%s2914_s17 + $0x30] sm:$0xff] %v888_v26 }
 0x31b   :  { %v808_v28 = vadd.f32 %v807_v27, %v710_v4  ;;  %v730_v4 = vpop.f32.mrf.mxu0 }
 0x31d   :  { %v841_v29 = vadd.f32 %v2456_v47, %v808_v28 }
 0x31f   :  { %vm857_vm7 = vcmp.gt.f32.partialorder %v841_v29, 0.0  ;;  %v873_v31 = vmul.f32 0.5, %v841_v29 }
 0x321   :  { %v889_v32 = vsel %vm857_vm7, %v841_v29, %v873_v31 }
 0x322   :  { %v810_v33 = vpop.f32.mrf.mxu1  ;;  %v901_v34 = vpack.c.bf16 %v889_v32, %v888_v26  ;;  %913 = vst [vmem:[%s2914_s17 + $0x38] sm:$0xff] %v889_v32 }
 0x323   :  { %v811_v35 = vadd.f32 %v810_v33, %v713_v18 }
 0x324   :  { %1014 = vmatmul.bf16.gmra.mxu2 %v901_v34  ;;  %1196 = vmatmul.bf16.gmra.mxu3 %v901_v34 }
 0x325   :  { %v842_v36 = vadd.f32 %v2456_v47, %v811_v35 }
 0x327   :  { %vm858_vm8 = vcmp.gt.f32.partialorder %v842_v36, 0.0  ;;  %v874_v37 = vmul.f32 0.5, %v842_v36 }
 0x329   :  { %v890_v40 = vsel %vm858_vm8, %v842_v36, %v874_v37  ;;  %v2009_v37 = vld [vmem:[%s2920_s15 + $0x38] sm:$0xff] }
 0x32a   :  { %v812_v41 = vpop.f32.mrf.mxu1  ;;  %914 = vst [vmem:[%s2914_s17 + $0x40] sm:$0xff] %v890_v40  ;;  %1573 = vmatpush.bf16.msra.mxu0 %v2009_v37 }
 0x32b   :  { %v813_v42 = vadd.f32 %v812_v41, %v715_v30 }
 0x32d   :  { %v843_v43 = vadd.f32 %v2456_v47, %v813_v42 }
 0x32f   :  { %vm859_vm9 = vcmp.gt.f32.partialorder %v843_v43, 0.0  ;;  %v875_v44 = vmul.f32 0.5, %v843_v43 }
 0x331   :  { %v891_v45 = vsel %vm859_vm9, %v843_v43, %v875_v44 }
 0x332   :  { %v815_v48 = vpop.f32.mrf.mxu1  ;;  %v902_v49 = vpack.c.bf16 %v891_v45, %v890_v40  ;;  %915 = vst [vmem:[%s2914_s17 + $0x48] sm:$0xff] %v891_v45 }
 0x333   :  { %v816_v51 = vadd.f32 %v815_v48, %v718_v39 }
 0x334   :  { %1019 = vmatmul.bf16.gmra.mxu2 %v902_v49  ;;  %1201 = vmatmul.bf16.gmra.mxu3 %v902_v49 }
 0x335   :  { %v844_v52 = vadd.f32 %v2456_v47, %v816_v51  ;;  %v2008_v51 = vld [vmem:[%s2920_s15 + $0x30] sm:$0xff] }
 0x336   :  { %1574 = vmatpush.bf16.msra.mxu0 %v2008_v51 }
 0x337   :  { %vm860_vm10 = vcmp.gt.f32.partialorder %v844_v52, 0.0  ;;  %v876_v53 = vmul.f32 0.5, %v844_v52 }
 0x339   :  { %v892_v54 = vsel %vm860_vm10, %v844_v52, %v876_v53 }
 0x33a   :  { %v817_v55 = vpop.f32.mrf.mxu1  ;;  %916 = vst [vmem:[%s2914_s17 + $0x50] sm:$0xff] %v892_v54 }
 0x33b   :  { %v818_v56 = vadd.f32 %v817_v55, %v720_v46 }
 0x33d   :  { %v845_v58 = vadd.f32 %v2456_v47, %v818_v56 }
 0x33f   :  { %vm861_vm11 = vcmp.gt.f32.partialorder %v845_v58, 0.0  ;;  %v877_v59 = vmul.f32 0.5, %v845_v58 }
 0x341   :  { %v893_v60 = vsel %vm861_vm11, %v845_v58, %v877_v59 }
 0x342   :  { %v820_v61 = vpop.f32.mrf.mxu1  ;;  %v903_v6 = vpack.c.bf16 %v893_v60, %v892_v54  ;;  %917 = vst [vmem:[%s2914_s17 + $0x58] sm:$0xff] %v893_v60 }
 0x343   :  { %v821_v62 = vadd.f32 %v820_v61, %v723_v57 }
 0x344   :  { %1024 = vmatmul.bf16.gmra.mxu2 %v903_v6  ;;  %1206 = vmatmul.bf16.gmra.mxu3 %v903_v6  ;;  %v2007_v6 = vld [vmem:[%s2920_s15 + $0x28] sm:$0xff] }
 0x345   :  { %v846_v38 = vadd.f32 %v2456_v47, %v821_v62  ;;  %1575 = vmatpush.bf16.msra.mxu0 %v2007_v6 }
 0x347   :  { %vm862_vm12 = vcmp.gt.f32.partialorder %v846_v38, 0.0  ;;  %v878_v10 = vmul.f32 0.5, %v846_v38 }
 0x349   :  { %v894_v22 = vsel %vm862_vm12, %v846_v38, %v878_v10 }
 0x34a   :  { %v822_v11 = vpop.f32.mrf.mxu1  ;;  %918 = vst [vmem:[%s2914_s17 + $0x60] sm:$0xff] %v894_v22 }
 0x34b   :  { %v823_v12 = vadd.f32 %v822_v11, %v725_v21 }
 0x34d   :  { %v847_v23 = vadd.f32 %v2456_v47, %v823_v12 }
 0x34f   :  { %vm863_vm13 = vcmp.gt.f32.partialorder %v847_v23, 0.0  ;;  %v879_v50 = vmul.f32 0.5, %v847_v23 }
 0x351   :  { %v895_v24 = vsel %vm863_vm13, %v847_v23, %v879_v50 }
 0x352   :  { %v825_v0 = vpop.f32.mrf.mxu1  ;;  %v904_v1 = vpack.c.bf16 %v895_v24, %v894_v22  ;;  %919 = vst [vmem:[%s2914_s17 + $0x68] sm:$0xff] %v895_v24  ;;  %v2006_v24 = vld [vmem:[%s2920_s15 + $0x20] sm:$0xff] }
 0x353   :  { %v826_v2 = vadd.f32 %v825_v0, %v728_v63  ;;  %1576 = vmatpush.bf16.msra.mxu0 %v2006_v24 }
 0x354   :  { %1029 = vmatmul.bf16.gmra.mxu2 %v904_v1  ;;  %1211 = vmatmul.bf16.gmra.mxu3 %v904_v1 }
 0x355   :  { %v848_v13 = vadd.f32 %v2456_v47, %v826_v2 }
 0x357   :  { %vm864_vm14 = vcmp.gt.f32.partialorder %v848_v13, 0.0  ;;  %v880_v25 = vmul.f32 0.5, %v848_v13 }
 0x359   :  { %v896_v3 = vsel %vm864_vm14, %v848_v13, %v880_v25 }
 0x35a   :  { %v827_v5 = vpop.f32.mrf.mxu1  ;;  %920 = vst [vmem:[%s2914_s17 + $0x70] sm:$0xff] %v896_v3 }
 0x35b   :  { %v828_v7 = vadd.f32 %v827_v5, %v730_v4 }
 0x35d   :  { %v849_v8 = vadd.f32 %v2456_v47, %v828_v7  ;;  %v2530_v47 = vstv %s2916_s0 }
 0x35f   :  { %vm865_vm15 = vcmp.gt.f32.partialorder %v849_v8, 0.0  ;;  %v881_v9 = vmul.f32 0.5, %v849_v8 }
 0x361   :  { %v897_v14 = vsel %vm865_vm15, %v849_v8, %v881_v9  ;;  %v2005_v9 = vld [vmem:[%s2920_s15 + $0x18] sm:$0xff] }
 0x362   :  { %v905_v15 = vpack.c.bf16 %v897_v14, %v896_v3  ;;  %921 = vst [vmem:[%s2914_s17 + $0x78] sm:$0xff] %v897_v14  ;;  %v2621_v14 = vld [vmem:[%s2915_s12] ss:$0 sm:$0xff]  ;;  %1577 = vmatpush.bf16.msra.mxu0 %v2005_v9 }
 0x364   :  { %1034 = vmatmul.bf16.gmra.mxu2 %v905_v15  ;;  %1216 = vmatmul.bf16.gmra.mxu3 %v905_v15 }
 0x377   :  { %v1000_v17 = vpop.f32.mrf.mxu2  ;;  %v2532_v18 = vpop.f32.mrf.mxu3 }
 0x378   :  { %v1001_v19 = vadd.f32 %v2525_v16, %v1000_v17 }
 0x37a   :  { %vm1040_vm0 = vcmp.gt.f32.partialorder %v1001_v19, 0.0  ;;  %v1057_v20 = vmul.f32 %v2530_v47, %v1001_v19 }
 0x37c   :  { %v1073_v26 = vsel %vm1040_vm0, %v1001_v19, %v1057_v20 }
 0x37d   :  { %1089 = vst [vmem:[%s2919_s18] sm:$0xff] %v1073_v26 }
 0x37f   :  { %v1002_v27 = vpop.f32.mrf.mxu2  ;;  %v2539_v28 = vpop.f32.mrf.mxu3 }
 0x380   :  { %v1003_v29 = vadd.f32 %v2525_v16, %v1002_v27  ;;  %v2626_v20 = vadd.f32 %v2621_v14, %v2539_v28  ;;  %v2631_v27 = vadd.f32 %v2621_v14, %v2532_v18 }
 0x382   :  { %vm1041_vm1 = vcmp.gt.f32.partialorder %v1003_v29, 0.0  ;;  %v1058_v30 = vmul.f32 %v2530_v47, %v1003_v29  ;;  %v1324_v18 = vmul.f32 %v2631_v27, %v2631_v27 }
 0x384   :  { %v1074_v31 = vsel %vm1041_vm1, %v1003_v29, %v1058_v30 }
 0x385   :  { %1090 = vst [vmem:[%s2919_s18 + $0x8] sm:$0xff] %v1074_v31  ;;  %v1325_v31 = vmul.f32 %v2626_v20, %v2626_v20 }
 0x387   :  { %v1005_v32 = vpop.f32.mrf.mxu2  ;;  %v2546_v33 = vpop.f32.mrf.mxu3 }
 0x388   :  { %v1006_v34 = vadd.f32 %v2525_v16, %v1005_v32  ;;  %v2635_v29 = vadd.f32 %v2621_v14, %v2546_v33 }
 0x38a   :  { %vm1042_vm2 = vcmp.gt.f32.partialorder %v1006_v34, 0.0  ;;  %v1059_v35 = vmul.f32 %v2530_v47, %v1006_v34  ;;  %v1326_v28 = vmul.f32 %v2635_v29, %v2635_v29 }
 0x38c   :  { %v1075_v36 = vsel %vm1042_vm2, %v1006_v34, %v1059_v35 }
 0x38d   :  { %1091 = vst [vmem:[%s2919_s18 + $0x10] sm:$0xff] %v1075_v36  ;;  %v1303_v36 = vadd.f32 %v2626_v20, %v2631_v27 }
 0x38f   :  { %v1007_v39 = vpop.f32.mrf.mxu2  ;;  %v2556_v40 = vpop.f32.mrf.mxu3 }
 0x390   :  { %v1008_v41 = vadd.f32 %v2525_v16, %v1007_v39  ;;  %v2641_v32 = vadd.f32 %v2621_v14, %v2556_v40  ;;  %v1340_v39 = vadd.f32 %v1325_v31, %v1324_v18 }
 0x392   :  { %vm1043_vm3 = vcmp.gt.f32.partialorder %v1008_v41, 0.0  ;;  %v1060_v42 = vmul.f32 %v2530_v47, %v1008_v41  ;;  %v1327_v40 = vmul.f32 %v2641_v32, %v2641_v32 }
 0x394   :  { %v1076_v43 = vsel %vm1043_vm3, %v1008_v41, %v1060_v42  ;;  %v1304_v42 = vadd.f32 %v1303_v36, %v2635_v29 }
 0x395   :  { %1092 = vst [vmem:[%s2919_s18 + $0x18] sm:$0xff] %v1076_v43 }
 0x397   :  { %v1010_v44 = vpop.f32.mrf.mxu2  ;;  %v2563_v45 = vpop.f32.mrf.mxu3 }
 0x398   :  { %v1011_v46 = vadd.f32 %v2525_v16, %v1010_v44  ;;  %v2652_v33 = vadd.f32 %v2621_v14, %v2563_v45  ;;  %v1341_v44 = vadd.f32 %v1340_v39, %v1326_v28 }
 0x39a   :  { %vm1044_vm4 = vcmp.gt.f32.partialorder %v1011_v46, 0.0  ;;  %v1061_v48 = vmul.f32 %v2530_v47, %v1011_v46  ;;  %v1328_v45 = vmul.f32 %v2652_v33, %v2652_v33 }
 0x39c   :  { %v1077_v49 = vsel %vm1044_vm4, %v1011_v46, %v1061_v48 }
 0x39d   :  { %1093 = vst [vmem:[%s2919_s18 + $0x20] sm:$0xff] %v1077_v49  ;;  %v1305_v49 = vadd.f32 %v1304_v42, %v2641_v32 }
 0x39f   :  { %v1012_v52 = vpop.f32.mrf.mxu2  ;;  %v2573_v53 = vpop.f32.mrf.mxu3 }
 0x3a0   :  { %v1013_v54 = vadd.f32 %v2525_v16, %v1012_v52  ;;  %v2661_v41 = vadd.f32 %v2621_v14, %v2573_v53  ;;  %v1342_v52 = vadd.f32 %v1341_v44, %v1327_v40 }
 0x3a2   :  { %vm1045_vm5 = vcmp.gt.f32.partialorder %v1013_v54, 0.0  ;;  %v1062_v55 = vmul.f32 %v2530_v47, %v1013_v54  ;;  %v1329_v53 = vmul.f32 %v2661_v41, %v2661_v41 }
 0x3a4   :  { %v1078_v56 = vsel %vm1045_vm5, %v1013_v54, %v1062_v55 }
 0x3a5   :  { %1094 = vst [vmem:[%s2919_s18 + $0x28] sm:$0xff] %v1078_v56  ;;  %v1306_v56 = vadd.f32 %v1305_v49, %v2652_v33 }
 0x3a7   :  { %v1015_v57 = vpop.f32.mrf.mxu2  ;;  %v2580_v58 = vpop.f32.mrf.mxu3 }
 0x3a8   :  { %v1016_v59 = vadd.f32 %v2525_v16, %v1015_v57  ;;  %v2669_v46 = vadd.f32 %v2621_v14, %v2580_v58  ;;  %v1343_v57 = vadd.f32 %v1342_v52, %v1328_v45 }
 0x3aa   :  { %vm1046_vm6 = vcmp.gt.f32.partialorder %v1016_v59, 0.0  ;;  %v1063_v60 = vmul.f32 %v2530_v47, %v1016_v59  ;;  %v1330_v58 = vmul.f32 %v2669_v46, %v2669_v46 }
 0x3ac   :  { %v1079_v61 = vsel %vm1046_vm6, %v1016_v59, %v1063_v60 }
 0x3ad   :  { %1095 = vst [vmem:[%s2919_s18 + $0x30] sm:$0xff] %v1079_v61 }
 0x3af   :  { %v1017_v62 = vpop.f32.mrf.mxu2  ;;  %v2590_v38 = vpop.f32.mrf.mxu3 }
 0x3b0   :  { %v1018_v21 = vadd.f32 %v2525_v16, %v1017_v62  ;;  %v2679_v54 = vadd.f32 %v2621_v14, %v2590_v38  ;;  %v1307_v62 = vadd.f32 %v1306_v56, %v2661_v41 }
 0x3b2   :  { %vm1047_vm7 = vcmp.gt.f32.partialorder %v1018_v21, 0.0  ;;  %v1064_v10 = vmul.f32 %v2530_v47, %v1018_v21 }
 0x3b4   :  { %v1080_v22 = vsel %vm1047_vm7, %v1018_v21, %v1064_v10  ;;  %v1344_v21 = vadd.f32 %v1343_v57, %v1329_v53  ;;  %v1331_v10 = vmul.f32 %v2679_v54, %v2679_v54 }
 0x3b5   :  { %1096 = vst [vmem:[%s2919_s18 + $0x38] sm:$0xff] %v1080_v22 }
 0x3b7   :  { %v1020_v11 = vpop.f32.mrf.mxu2  ;;  %v1202_v12 = vpop.f32.mrf.mxu3 }
 0x3b8   :  { %v1021_v23 = vadd.f32 %v2525_v16, %v1020_v11  ;;  %v2672_v48 = vadd.f32 %v2621_v14, %v1202_v12  ;;  %v1308_v12 = vadd.f32 %v1307_v62, %v2669_v46 }
 0x3ba   :  { %vm1048_vm8 = vcmp.gt.f32.partialorder %v1021_v23, 0.0  ;;  %v1065_v50 = vmul.f32 %v2530_v47, %v1021_v23  ;;  %v1295_v59 = vmul.f32 0.0, %v2672_v48 }
 0x3bc   :  { %v1081_v63 = vsel %vm1048_vm8, %v1021_v23, %v1065_v50  ;;  %v1345_v50 = vadd.f32 %v1344_v21, %v1330_v58 }
 0x3bd   :  { %1097 = vst [vmem:[%s2919_s18 + $0x40] sm:$0xff] %v1081_v63  ;;  %v1332_v63 = vmul.f32 %v1295_v59, %v1295_v59 }
 0x3bf   :  { %v1022_v0 = vpop.f32.mrf.mxu2  ;;  %v1204_v1 = vpop.f32.mrf.mxu3 }
 0x3c0   :  { %v1023_v2 = vadd.f32 %v2525_v16, %v1022_v0  ;;  %v2682_v55 = vadd.f32 %v2621_v14, %v1204_v1  ;;  %v1309_v1 = vadd.f32 %v1308_v12, %v2679_v54 }
 0x3c2   :  { %vm1049_vm9 = vcmp.gt.f32.partialorder %v1023_v2, 0.0  ;;  %v1066_v13 = vmul.f32 %v2530_v47, %v1023_v2  ;;  %v1296_v22 = vmul.f32 0.0, %v2682_v55 }
 0x3c4   :  { %v1082_v25 = vsel %vm1049_vm9, %v1023_v2, %v1066_v13  ;;  %v1346_v13 = vadd.f32 %v1345_v50, %v1331_v10 }
 0x3c5   :  { %1098 = vst [vmem:[%s2919_s18 + $0x48] sm:$0xff] %v1082_v25  ;;  %v1333_v25 = vmul.f32 %v1296_v22, %v1296_v22 }
 0x3c7   :  { %v1025_v3 = vpop.f32.mrf.mxu2  ;;  %v1207_v4 = vpop.f32.mrf.mxu3 }
 0x3c8   :  { %v1026_v5 = vadd.f32 %v2525_v16, %v1025_v3  ;;  %v2692_v60 = vadd.f32 %v2621_v14, %v1207_v4 }
 0x3ca   :  { %vm1050_vm10 = vcmp.gt.f32.partialorder %v1026_v5, 0.0  ;;  %v1067_v7 = vmul.f32 %v2530_v47, %v1026_v5  ;;  %v1297_v24 = vmul.f32 0.0, %v2692_v60 }
 0x3cc   :  { %v1083_v8 = vsel %vm1050_vm10, %v1026_v5, %v1067_v7  ;;  %v1310_v5 = vadd.f32 %v1309_v1, %v1295_v59  ;;  %v1347_v7 = vadd.f32 %v1346_v13, %v1332_v63 }
 0x3cd   :  { %1099 = vst [vmem:[%s2919_s18 + $0x50] sm:$0xff] %v1083_v8  ;;  %v1334_v8 = vmul.f32 %v1297_v24, %v1297_v24 }
 0x3ce   :  { %v1348_v31 = vadd.f32 %v1347_v7, %v1333_v25 }
 0x3cf   :  { %v1027_v15 = vpop.f32.mrf.mxu2  ;;  %v1209_v17 = vpop.f32.mrf.mxu3 }
 0x3d0   :  { %v1028_v19 = vadd.f32 %v2525_v16, %v1027_v15  ;;  %v2700_v11 = vadd.f32 %v2621_v14, %v1209_v17  ;;  %v1349_v36 = vadd.f32 %v1348_v31, %v1334_v8 }
 0x3d2   :  { %vm1051_vm11 = vcmp.gt.f32.partialorder %v1028_v19, 0.0  ;;  %v1068_v26 = vmul.f32 %v2530_v47, %v1028_v19  ;;  %v1298_v3 = vmul.f32 0.0, %v2700_v11 }
 0x3d4   :  { %v1084_v30 = vsel %vm1051_vm11, %v1028_v19, %v1068_v26  ;;  %v1311_v19 = vadd.f32 %v1310_v5, %v1296_v22  ;;  %v1335_v18 = vmul.f32 %v1298_v3, %v1298_v3  ;;  %v2003_v5 = vld [vmem:[%s2920_s15 + $0x8] sm:$0xff] }
 0x3d5   :  { %1100 = vst [vmem:[%s2919_s18 + $0x58] sm:$0xff] %v1084_v30 }
 0x3d7   :  { %v1030_v34 = vpop.f32.mrf.mxu2  ;;  %v1212_v35 = vpop.f32.mrf.mxu3 }
 0x3d8   :  { %v1031_v37 = vadd.f32 %v2525_v16, %v1030_v34  ;;  %v2706_v0 = vadd.f32 %v2621_v14, %v1212_v35  ;;  %v1312_v34 = vadd.f32 %v1311_v19, %v1297_v24 }
 0x3da   :  { %vm1052_vm12 = vcmp.gt.f32.partialorder %v1031_v37, 0.0  ;;  %v1069_v43 = vmul.f32 %v2530_v47, %v1031_v37  ;;  %v1299_v9 = vmul.f32 0.0, %v2706_v0  ;;  %v1313_v39 = vadd.f32 %v1312_v34, %v1298_v3 }
 0x3dc   :  { %v1085_v51 = vsel %vm1052_vm12, %v1031_v37, %v1069_v43  ;;  %v1336_v37 = vmul.f32 %v1299_v9, %v1299_v9  ;;  %v1350_v43 = vadd.f32 %v1349_v36, %v1335_v18  ;;  %v1314_v45 = vadd.f32 %v1313_v39, %v1299_v9  ;;  %v2002_v9 = vld [vmem:[%s2920_s15] sm:$0xff] }
 0x3dd   :  { %1101 = vst [vmem:[%s2919_s18 + $0x60] sm:$0xff] %v1085_v51 }
 0x3de   :  { %v1351_v49 = vadd.f32 %v1350_v43, %v1336_v37 }
 0x3df   :  { %v1032_v61 = vpop.f32.mrf.mxu2  ;;  %v1214_v6 = vpop.f32.mrf.mxu3 }
 0x3e0   :  { %v1033_v38 = vadd.f32 %v2525_v16, %v1032_v61  ;;  %v2714_v4 = vadd.f32 %v2621_v14, %v1214_v6 }
 0x3e2   :  { %vm1053_vm13 = vcmp.gt.f32.partialorder %v1033_v38, 0.0  ;;  %v1070_v23 = vmul.f32 %v2530_v47, %v1033_v38  ;;  %v1300_v28 = vmul.f32 0.0, %v2714_v4 }
 0x3e4   :  { %v1086_v2 = vsel %vm1053_vm13, %v1033_v38, %v1070_v23  ;;  %v1337_v44 = vmul.f32 %v1300_v28, %v1300_v28  ;;  %v1315_v53 = vadd.f32 %v1314_v45, %v1300_v28 }
 0x3e5   :  { %1102 = vst [vmem:[%s2919_s18 + $0x68] sm:$0xff] %v1086_v2 }
 0x3e6   :  { %v1352_v59 = vadd.f32 %v1351_v49, %v1337_v44 }
 0x3e7   :  { %v1035_v15 = vpop.f32.mrf.mxu2  ;;  %v1217_v17 = vpop.f32.mrf.mxu3 }
 0x3e8   :  { %v1036_v26 = vadd.f32 %v2525_v16, %v1035_v15  ;;  %v2719_v30 = vadd.f32 %v2621_v14, %v1217_v17 }
 0x3ea   :  { %vm1054_vm14 = vcmp.gt.f32.partialorder %v1036_v26, 0.0  ;;  %v1071_v35 = vmul.f32 %v2530_v47, %v1036_v26  ;;  %v1301_v42 = vmul.f32 0.0, %v2719_v30 }
 0x3ec   :  { %v1087_v40 = vsel %vm1054_vm14, %v1036_v26, %v1071_v35  ;;  %v1338_v56 = vmul.f32 %v1301_v42, %v1301_v42  ;;  %v1316_v61 = vadd.f32 %v1315_v53, %v1301_v42 }
 0x3ed   :  { %1103 = vst [vmem:[%s2919_s18 + $0x70] sm:$0xff] %v1087_v40 }
 0x3ee   :  { %v1353_v38 = vadd.f32 %v1352_v59, %v1338_v56 }
 0x3ef   :  { %v1037_v51 = vpop.f32.mrf.mxu2  ;;  %v1219_v52 = vpop.f32.mrf.mxu3 }
 0x3f0   :  { %v1038_v57 = vadd.f32 %v2525_v16, %v1037_v51  ;;  %v1220_v58 = vadd.f32 %v2621_v14, %v1219_v52 }
 0x3f2   :  { %vm1055_vm15 = vcmp.gt.f32.partialorder %v1038_v57, 0.0  ;;  %v1072_v6 = vmul.f32 %v2530_v47, %v1038_v57  ;;  %v1302_v62 = vmul.f32 0.0, %v1220_v58  ;;  %v2004_v47 = vld [vmem:[%s2920_s15 + $0x10] sm:$0xff] }
 0x3f3   :  { %1578 = vmatpush.bf16.msra.mxu0 %v2004_v47 }
 0x3f4   :  { %v1088_v21 = vsel %vm1055_vm15, %v1038_v57, %v1072_v6  ;;  %v1317_v10 = vadd.f32 %v1316_v61, %v1302_v62  ;;  %v1339_v22 = vmul.f32 %v1302_v62, %v1302_v62  ;;  %v2776_v57 = vld [vmem:[%s2918_s14] ss:$0 sm:$0xff] }
 0x3f5   :  { %1104 = vst [vmem:[%s2919_s18 + $0x78] sm:$0xff] %v1088_v21 }
 0x3f6   :  { %v1318_v12 = vrot.slane %v1317_v10, 4  ;;  %v1354_v23 = vadd.f32 %v1353_v38, %v1339_v22 }
 0x3f7   :  { %1579 = vmatpush.bf16.msra.mxu0 %v2003_v5 }
 0x3f8   :  { %v1319_v50 = vadd.f32 %v1318_v12, %v1317_v10  ;;  %v1355_v16 = vrot.slane %v1354_v23, 4 }
 0x3fa   :  { %v1320_v63 = vrot.slane %v1319_v50, 2  ;;  %v1356_v14 = vadd.f32 %v1355_v16, %v1354_v23 }
 0x3fb   :  { %1580 = vmatpush.bf16.msra.mxu0 %v2002_v9 }
 0x3fc   :  { %v1321_v24 = vadd.f32 %v1320_v63, %v1319_v50  ;;  %v1357_v1 = vrot.slane %v1356_v14, 2 }
 0x3fe   :  { %v1322_v2 = vrot.slane %v1321_v24, 1  ;;  %v1358_v13 = vadd.f32 %v1357_v1, %v1356_v14 }
 0x400   :  { %v1323_v25 = vadd.f32 %v1322_v2, %v1321_v24  ;;  %v1359_v3 = vrot.slane %v1358_v13, 1 }
 0x402   :  { %v1360_v7 = vadd.f32 %v1359_v3, %v1358_v13  ;;  %v2739_v8 = vmul.f32 0.015625, %v1323_v25 }
 0x404   :  { %v1362_v15 = vmul.f32 0.015625, %v1360_v7  ;;  %v1363_v17 = vmul.f32 %v2739_v8, %v2739_v8  ;;  %v1381_v19 = vsub.f32 %v1220_v58, %v2739_v8  ;;  %v1376_v31 = vsub.f32 %v2692_v60, %v2739_v8 }
 0x405   :  { %v1377_v18 = vsub.f32 %v2700_v11, %v2739_v8  ;;  %v1378_v34 = vsub.f32 %v2706_v0, %v2739_v8  ;;  %v1379_v35 = vsub.f32 %v2714_v4, %v2739_v8  ;;  %v1380_v36 = vsub.f32 %v2719_v30, %v2739_v8  ;;  %v2760_v11 = vld [vmem:[%s2917_s13] ss:$0 sm:$0xff] }
 0x406   :  { %v1364_v26 = vsub.f32 %v1362_v15, %v1363_v17  ;;  %v1366_v45 = vsub.f32 %v2631_v27, %v2739_v8  ;;  %v1367_v49 = vsub.f32 %v2626_v20, %v2739_v8  ;;  %v1368_v52 = vsub.f32 %v2635_v29, %v2739_v8 }
 0x407   :  { %v1369_v53 = vsub.f32 %v2641_v32, %v2739_v8  ;;  %v1374_v14 = vsub.f32 %v2672_v48, %v2739_v8  ;;  %v1375_v24 = vsub.f32 %v2682_v55, %v2739_v8  ;;  %v1370_v47 = vsub.f32 %v2652_v33, %v2739_v8 }
 0x408   :  { %v1365_v28 = vmax.f32 %v1364_v26, 0.0  ;;  %v1371_v3 = vsub.f32 %v2661_v41, %v2739_v8 }
 0x40a   :  { %v1382_v37 = vadd.f32 1e-05, %v1365_v28 }
 0x40c   :  { %2041 = vrsqrt.f32 %v1382_v37  ;;  %vm1389_vm1 = vweird.f32 %v1382_v37 }
 0x412   :  { %v2042_v39 = vpop.eup %2041 }
 0x413   :  { %v1384_v40 = vmul.f32 %v2042_v39, %v1382_v37  ;;  %vm1390_vm0 = vweird.f32 %v2042_v39 }
 0x414   :  { %vm1391_vm2 = vmor %vm1389_vm1, %vm1390_vm0 }
 0x415   :  { %v1385_v42 = vmul.f32 %v2042_v39, %v1384_v40 }
 0x417   :  { %v1386_v43 = vmul.f32 0.5, %v1385_v42 }
 0x419   :  { %v1387_v60 = vsub.f32 1.5, %v1386_v43 }
 0x41b   :  { %v1388_v44 = vmul.f32 %v2042_v39, %v1387_v60 }
 0x41d   :  { %v2766_v51 = vsel %vm1391_vm2, %v2042_v39, %v1388_v44 }
 0x41e   :  { %v1408_v56 = vmul.f32 %v2766_v51, %v1381_v19  ;;  %v1393_v27 = vmul.f32 %v2766_v51, %v1366_v45  ;;  %v1394_v58 = vmul.f32 %v2766_v51, %v1367_v49  ;;  %v1395_v20 = vmul.f32 %v2766_v51, %v1368_v52 }
 0x41f   :  { %v1396_v59 = vmul.f32 %v2766_v51, %v1369_v53  ;;  %v1401_v2 = vmul.f32 %v2766_v51, %v1374_v14  ;;  %v1402_v13 = vmul.f32 %v2766_v51, %v1375_v24  ;;  %v1403_v25 = vmul.f32 %v2766_v51, %v1376_v31 }
 0x420   :  { %v1428_v29 = vmul.f32 %v2760_v11, %v1408_v56  ;;  %v1413_v61 = vmul.f32 %v2760_v11, %v1393_v27  ;;  %v1414_v32 = vmul.f32 %v2760_v11, %v1394_v58  ;;  %v1415_v21 = vmul.f32 %v2760_v11, %v1395_v20 }
 0x421   :  { %v1416_v10 = vmul.f32 %v2760_v11, %v1396_v59  ;;  %v1397_v48 = vmul.f32 %v2766_v51, %v1370_v47  ;;  %v1421_v55 = vmul.f32 %v2760_v11, %v1401_v2  ;;  %v1422_v7 = vmul.f32 %v2760_v11, %v1402_v13 }
 0x422   :  { %v2786_v6 = vadd.f32 %v2776_v57, %v1428_v29  ;;  %v1433_v62 = vadd.f32 %v2776_v57, %v1413_v61  ;;  %v1434_v38 = vadd.f32 %v2776_v57, %v1414_v32  ;;  %v1435_v63 = vadd.f32 %v2776_v57, %v1415_v21 }
 0x423   :  { %v1436_v1 = vadd.f32 %v2776_v57, %v1416_v10  ;;  %v1404_v9 = vmul.f32 %v2766_v51, %v1377_v18  ;;  %v1398_v33 = vmul.f32 %v2766_v51, %v1371_v3  ;;  %v1423_v15 = vmul.f32 %v2760_v11, %v1403_v25 }
 0x424   :  { %vm1449_vm3 = vcmp.gt.f32.partialorder %v1433_v62, 0.0  ;;  %vm1450_vm4 = vcmp.gt.f32.partialorder %v1434_v38, 0.0  ;;  %v1465_v22 = vmul.f32 0.01, %v1433_v62  ;;  %v1466_v12 = vmul.f32 0.01, %v1434_v38 }
 0x425   :  { %v1467_v5 = vmul.f32 0.01, %v1435_v63  ;;  %vm1451_vm5 = vcmp.gt.f32.partialorder %v1435_v63, 0.0  ;;  %vm1452_vm6 = vcmp.gt.f32.partialorder %v1436_v1, 0.0  ;;  %v1441_v17 = vadd.f32 %v2776_v57, %v1421_v55 }
 0x426   :  { %v1481_v23 = vsel %vm1449_vm3, %v1433_v62, %v1465_v22  ;;  %v1482_v50 = vsel %vm1450_vm4, %v1434_v38, %v1466_v12  ;;  %v1442_v19 = vadd.f32 %v2776_v57, %v1422_v7  ;;  %v1424_v41 = vmul.f32 %v2760_v11, %v1404_v9 }
 0x427   :  { %v1497_v16 = vpack.c.bf16 %v1482_v50, %v1481_v23  ;;  %v1405_v26 = vmul.f32 %v2766_v51, %v1378_v34  ;;  %v1468_v31 = vmul.f32 0.01, %v1436_v1  ;;  %v1443_v18 = vadd.f32 %v2776_v57, %v1423_v15 }
 0x428   :  { %v1406_v28 = vmul.f32 %v2766_v51, %v1379_v35  ;;  %v1407_v37 = vmul.f32 %v2766_v51, %v1380_v36  ;;  %v1483_v39 = vsel %vm1451_vm5, %v1435_v63, %v1467_v5  ;;  %vm1457_vm7 = vcmp.gt.f32.partialorder %v1441_v17, 0.0 }
 0x429   :  { %1581 = vmatmul.bf16.vlgmr.msra.gmra.mxu0 %v1497_v16  ;;  %vm1458_vm8 = vcmp.gt.f32.partialorder %v1442_v19, 0.0  ;;  %v1473_v40 = vmul.f32 0.01, %v1441_v17  ;;  %v1474_v0 = vmul.f32 0.01, %v1442_v19  ;;  %v1444_v34 = vadd.f32 %v2776_v57, %v1424_v41 }
 0x42a   :  { %vm1459_vm9 = vcmp.gt.f32.partialorder %v1443_v18, 0.0  ;;  %v1475_v42 = vmul.f32 0.01, %v1443_v18  ;;  %v1425_v60 = vmul.f32 %v2760_v11, %v1405_v26  ;;  %v1426_v4 = vmul.f32 %v2760_v11, %v1406_v28 }
 0x42b   :  { %v1489_v43 = vsel %vm1457_vm7, %v1441_v17, %v1473_v40  ;;  %v1427_v35 = vmul.f32 %v2760_v11, %v1407_v37  ;;  %v1490_v44 = vsel %vm1458_vm8, %v1442_v19, %v1474_v0  ;;  %vm1460_vm10 = vcmp.gt.f32.partialorder %v1444_v34, 0.0 }
 0x42c   :  { %v1476_v30 = vmul.f32 0.01, %v1444_v34  ;;  %v1491_v36 = vsel %vm1459_vm9, %v1443_v18, %v1475_v42  ;;  %v1501_v45 = vpack.c.bf16 %v1490_v44, %v1489_v43  ;;  %v1445_v49 = vadd.f32 %v2776_v57, %v1425_v60 }
 0x42d   :  { %v1446_v52 = vadd.f32 %v2776_v57, %v1426_v4  ;;  %v1447_v53 = vadd.f32 %v2776_v57, %v1427_v35  ;;  %v1484_v56 = vsel %vm1452_vm6, %v1436_v1, %v1468_v31  ;;  %vm1464_vm11 = vcmp.gt.f32.partialorder %v2786_v6, 0.0 }
 0x42e   :  { %v1492_v27 = vsel %vm1460_vm10, %v1444_v34, %v1476_v30  ;;  %v1480_v58 = vmul.f32 0.01, %v2786_v6  ;;  %vm1461_vm12 = vcmp.gt.f32.partialorder %v1445_v49, 0.0  ;;  %v1477_v59 = vmul.f32 0.01, %v1445_v49 }
 0x42f   :  { %v1502_v20 = vpack.c.bf16 %v1492_v27, %v1491_v36  ;;  %vm1462_vm13 = vcmp.gt.f32.partialorder %v1446_v52, 0.0  ;;  %v1478_v29 = vmul.f32 0.01, %v1446_v52  ;;  %vm1463_vm14 = vcmp.gt.f32.partialorder %v1447_v53, 0.0 }
 0x430   :  { %v1479_v61 = vmul.f32 0.01, %v1447_v53  ;;  %v1496_v32 = vsel %vm1464_vm11, %v2786_v6, %v1480_v58  ;;  %v1498_v62 = vpack.c.bf16 %v1484_v56, %v1483_v39  ;;  %v1493_v38 = vsel %vm1461_vm12, %v1445_v49, %v1477_v59 }
 0x431   :  { %v1417_v21 = vmul.f32 %v2760_v11, %v1397_v48  ;;  %v1418_v10 = vmul.f32 %v2760_v11, %v1398_v33  ;;  %v1494_v22 = vsel %vm1462_vm13, %v1446_v52, %v1478_v29  ;;  %v1372_v6 = vsub.f32 %v2669_v46, %v2739_v8 }
 0x432   :  { %v1495_v12 = vsel %vm1463_vm14, %v1447_v53, %v1479_v61  ;;  %v1503_v23 = vpack.c.bf16 %v1494_v22, %v1493_v38  ;;  %v1373_v1 = vsub.f32 %v2679_v54, %v2739_v8 }
 0x433   :  { %v1504_v50 = vpack.c.bf16 %v1496_v32, %v1495_v12  ;;  %v1437_v16 = vadd.f32 %v2776_v57, %v1417_v21  ;;  %v1438_v63 = vadd.f32 %v2776_v57, %v1418_v10  ;;  %v1399_v13 = vmul.f32 %v2766_v51, %v1372_v6 }
 0x434   :  { %v1400_v25 = vmul.f32 %v2766_v51, %v1373_v1 }
 0x435   :  { %v1469_v14 = vmul.f32 0.01, %v1437_v16  ;;  %v1470_v24 = vmul.f32 0.01, %v1438_v63  ;;  %vm1453_vm15 = vcmp.gt.f32.partialorder %v1437_v16, 0.0  ;;  %vm1454_vm0 = vcmp.gt.f32.partialorder %v1438_v63, 0.0 }
 0x436   :  { %v1419_v48 = vmul.f32 %v2760_v11, %v1399_v13  ;;  %v1420_v5 = vmul.f32 %v2760_v11, %v1400_v25  ;;  %v2040_v11 = vld [vmem:[%s2921_s16] ss:$0 sm:$0xff] }
 0x437   :  { %v1485_v47 = vsel %vm1453_vm15, %v1437_v16, %v1469_v14  ;;  %v1486_v2 = vsel %vm1454_vm0, %v1438_v63, %v1470_v24 }
 0x438   :  { %v1499_v3 = vpack.c.bf16 %v1486_v2, %v1485_v47  ;;  %v1439_v55 = vadd.f32 %v2776_v57, %v1419_v48  ;;  %v1440_v7 = vadd.f32 %v2776_v57, %v1420_v5 }
 0x439   :  { %1586 = vmatmul.bf16.gmra.mxu0 %v1498_v62 }
 0x43a   :  { %v1471_v46 = vmul.f32 0.01, %v1439_v55  ;;  %v1472_v9 = vmul.f32 0.01, %v1440_v7  ;;  %vm1455_vm1 = vcmp.gt.f32.partialorder %v1439_v55, 0.0  ;;  %vm1456_vm2 = vcmp.gt.f32.partialorder %v1440_v7, 0.0 }
 0x43c   :  { %v1487_v54 = vsel %vm1455_vm1, %v1439_v55, %v1471_v46  ;;  %v1488_v8 = vsel %vm1456_vm2, %v1440_v7, %v1472_v9 }
 0x43d   :  { %v1500_v33 = vpack.c.bf16 %v1488_v8, %v1487_v54 }
 0x449   :  { %1591 = vmatmul.bf16.gmra.mxu0 %v1499_v3 }
 0x459   :  { %1596 = vmatmul.bf16.gmra.mxu0 %v1500_v33 }
 0x469   :  { %1601 = vmatmul.bf16.gmra.mxu0 %v1501_v45 }
 0x479   :  { %1606 = vmatmul.bf16.gmra.mxu0 %v1502_v20 }
 0x489   :  { %1611 = vmatmul.bf16.gmra.mxu0 %v1503_v23 }
 0x499   :  { %1616 = vmatmul.bf16.gmra.mxu0 %v1504_v50 }
 0x4a6   :  { %v1582_v51 = vpop.f32.mrf.mxu0 }
 0x4a7   :  { %v1583_v15 = vadd.f32 %v2040_v11, %v1582_v51 }
 0x4a9   :  { %1622 = vst [vmem:[%s2922_s19] sm:$0xff] %v1583_v15 }
 0x4ae   :  { %v1584_v57 = vpop.f32.mrf.mxu0 }
 0x4af   :  { %v1585_v17 = vadd.f32 %v2040_v11, %v1584_v57 }
 0x4b1   :  { %1623 = vst [vmem:[%s2922_s19 + $0x8] sm:$0xff] %v1585_v17 }
 0x4b6   :  { %v1587_v19 = vpop.f32.mrf.mxu0 }
 0x4b7   :  { %v1588_v41 = vadd.f32 %v2040_v11, %v1587_v19 }
 0x4b9   :  { %1624 = vst [vmem:[%s2922_s19 + $0x10] sm:$0xff] %v1588_v41 }
 0x4be   :  { %v1589_v26 = vpop.f32.mrf.mxu0 }
 0x4bf   :  { %v1590_v31 = vadd.f32 %v2040_v11, %v1589_v26 }
 0x4c1   :  { %1625 = vst [vmem:[%s2922_s19 + $0x18] sm:$0xff] %v1590_v31 }
 0x4c6   :  { %v1592_v18 = vpop.f32.mrf.mxu0 }
 0x4c7   :  { %v1593_v28 = vadd.f32 %v2040_v11, %v1592_v18 }
 0x4c9   :  { %1626 = vst [vmem:[%s2922_s19 + $0x20] sm:$0xff] %v1593_v28 }
 0x4ce   :  { %v1594_v37 = vpop.f32.mrf.mxu0 }
 0x4cf   :  { %v1595_v39 = vadd.f32 %v2040_v11, %v1594_v37 }
 0x4d1   :  { %1627 = vst [vmem:[%s2922_s19 + $0x28] sm:$0xff] %v1595_v39 }
 0x4d6   :  { %v1597_v40 = vpop.f32.mrf.mxu0 }
 0x4d7   :  { %v1598_v0 = vadd.f32 %v2040_v11, %v1597_v40 }
 0x4d9   :  { %1628 = vst [vmem:[%s2922_s19 + $0x30] sm:$0xff] %v1598_v0 }
 0x4de   :  { %v1599_v34 = vpop.f32.mrf.mxu0 }
 0x4df   :  { %v1600_v42 = vadd.f32 %v2040_v11, %v1599_v34 }
 0x4e1   :  { %1629 = vst [vmem:[%s2922_s19 + $0x38] sm:$0xff] %v1600_v42 }
 0x4e6   :  { %v1602_v43 = vpop.f32.mrf.mxu0 }
 0x4e7   :  { %v1603_v60 = vadd.f32 %v2040_v11, %v1602_v43 }
 0x4e9   :  { %1630 = vst [vmem:[%s2922_s19 + $0x40] sm:$0xff] %v1603_v60 }
 0x4ee   :  { %v1604_v4 = vpop.f32.mrf.mxu0 }
 0x4ef   :  { %v1605_v35 = vadd.f32 %v2040_v11, %v1604_v4 }
 0x4f1   :  { %1631 = vst [vmem:[%s2922_s19 + $0x48] sm:$0xff] %v1605_v35 }
 0x4f6   :  { %v1607_v44 = vpop.f32.mrf.mxu0 }
 0x4f7   :  { %v1608_v30 = vadd.f32 %v2040_v11, %v1607_v44 }
 0x4f9   :  { %1632 = vst [vmem:[%s2922_s19 + $0x50] sm:$0xff] %v1608_v30 }
 0x4fe   :  { %v1609_v36 = vpop.f32.mrf.mxu0 }
 0x4ff   :  { %v1610_v45 = vadd.f32 %v2040_v11, %v1609_v36 }
 0x501   :  { %1633 = vst [vmem:[%s2922_s19 + $0x58] sm:$0xff] %v1610_v45 }
 0x506   :  { %v1612_v49 = vpop.f32.mrf.mxu0 }
 0x507   :  { %v1613_v52 = vadd.f32 %v2040_v11, %v1612_v49 }
 0x509   :  { %1634 = vst [vmem:[%s2922_s19 + $0x60] sm:$0xff] %v1613_v52 }
 0x50e   :  { %v1614_v53 = vpop.f32.mrf.mxu0 }
 0x50f   :  { %v1615_v56 = vadd.f32 %v2040_v11, %v1614_v53 }
 0x511   :  { %1635 = vst [vmem:[%s2922_s19 + $0x68] sm:$0xff] %v1615_v56 }
 0x516   :  { %v1617_v27 = vpop.f32.mrf.mxu0 }
 0x517   :  { %v1618_v58 = vadd.f32 %v2040_v11, %v1617_v27 }
 0x519   :  { %1636 = vst [vmem:[%s2922_s19 + $0x70] sm:$0xff] %v1618_v58 }
 0x51e   :  { %v1619_v20 = vpop.f32.mrf.mxu0 }
 0x51f   :  { %v1620_v59 = vadd.f32 %v2040_v11, %v1619_v20 }
 0x521   :  { %1637 = vst [vmem:[%s2922_s19 + $0x78] sm:$0xff] %v1620_v59 }

</bundles_post_ra>
